<compile_context>
chip_gen: v7x
topology: tpu7x:2x2x1
jax: 0.10.0
libtpu: 0.0.40
codegen_flags: <defaults>
</compile_context>

<pallas_src>
import jax
import jax.numpy as jnp
from jax.experimental import pallas as pl
from jax.experimental.pallas import tpu as pltpu


def resblock_kernel(x_ref, m1_ref, b1_ref, m2_ref, b2_ref, o_ref):
    """One grid step = NB images.

    x_ref  : (NB, H, W*C)     inputs, channels packed into lanes (index w*C + c)
    m1_ref : (3*W*C, W*C)     conv1 banded weights, ky taps stacked along K (BN1 scale folded)
    b1_ref : (1, W*C)         BN1 bias broadcast over width
    m2_ref : (3*W*C, W*C)     conv2 banded weights (BN2 scale folded)
    b2_ref : (1, W*C)         BN2 bias broadcast over width
    o_ref  : (NB, H, W*C)     outputs
    """
    NB, H, WC = x_ref.shape
    M = NB * H
    x = x_ref[...].reshape(M, WC)          # free reshape: collapse (NB, H) -> M rows

    # Per-image height-halo masks (row 0 has no "up" neighbour, row H-1 no "down").
    # Computed once, reused by both convs.  Pure VPU work.
    row = jax.lax.broadcasted_iota(jnp.int32, (M, WC), 0)
    h_in_img = row % H
    has_up = h_in_img != 0
    has_dn = h_in_img != (H - 1)

    def conv3x3(a, m_ref):
        # Row shifts via sublane rotation (XLU) + zero mask at image edges (VPU);
        # wrap-around rows from the roll are exactly the rows the mask kills.
        up = jnp.where(has_up, pltpu.roll(a, shift=1, axis=0), 0.0)      # row h-1
        dn = jnp.where(has_dn, pltpu.roll(a, shift=M - 1, axis=0), 0.0)  # row h+1
        # Lane-aligned concat -> (M, 3*WC); single MXU dot with K = 3*WC.
        lhs = jnp.concatenate([up, a, dn], axis=-1)
        return jnp.dot(lhs.astype(m_ref.dtype), m_ref[...],
                       preferred_element_type=jnp.float32)

    # conv1 + BN1 bias + ReLU (f32 elementwise)
    h1 = jnp.maximum(conv3x3(x, m1_ref) + b1_ref[...], 0.0)
    # conv2 + BN2 bias + identity shortcut (Cin == Cout, lane packing matches) + ReLU
    out = conv3x3(h1, m2_ref) + b2_ref[...] + x
    o_ref[...] = jnp.maximum(out, 0.0).reshape(NB, H, WC)


def _banded_weights(w_hwio, scale, W, dtype):
    """Fold a 3x3 conv (HWIO) + per-output-channel scale into a stacked banded matrix
    of shape (3*W*Cin, W*Cout).  For tap ky:
        M[ky*W*Cin + wi*Cin + ci, wo*Cout + co] = scale[co] * w[ky, wi - wo + 1, ci, co]
    (zero outside the 3-tap band).  The band embeds the width zero-padding, so the
    kernel needs no W halo; the ky taps stack along K so the kernel does one dot."""
    w = w_hwio * scale[None, None, None, :]
    mats = []
    for ky in range(3):
        m = sum(jnp.kron(jnp.eye(W, k=1 - kx, dtype=w.dtype), w[ky, kx])
                for kx in range(3))
        mats.append(m)
    return jnp.concatenate(mats, axis=0).astype(dtype)   # (3*W*Cin, W*Cout)


def _pick_nb(n, h, max_m=256):
    """Images per grid step: largest divisor of n with nb*h <= max_m that still
    leaves a grid of >= 2 steps (so v7x's two TensorCores both get work)."""
    divisors = [d for d in range(1, n + 1) if n % d == 0]
    cands = [d for d in divisors if d * h <= max_m and n // d >= 2]
    if not cands:
        cands = [d for d in divisors if d * h <= max_m] or [1]
    return max(cands)


def residual_block_toy(x_nchw, params, eps=1e-5, compute_dtype=jnp.bfloat16):
    """Wrapper: NCHW in/out, BN folding, banded-weight construction, pallas_call.

    compute_dtype: dtype of the MXU operands (banded weights + LHS cast).
                   bf16 (default) ~2-3x dot throughput on v6e/v7x; f32 for exact parity.
    """
    N, C, H, W = x_nchw.shape
    Cout, Cin = params["w1"].shape[0], params["w1"].shape[1]
    # Identity shortcut (stride=1, shortcut=None) requires Cin == Cout.
    assert Cin == C and Cout == C, "identity shortcut requires inchannel == outchannel"
    WC = W * C
    # Lane-dense layout requirement (unmasked full-lane loads/stores).
    assert WC % 128 == 0, f"W*C (= {WC}) must be a multiple of 128 for this kernel"

    NB = _pick_nb(N, H)
    grid = (N // NB,)

    # Layout plumbing only: NCHW -> NHWC -> (N, H, W*C) so lanes hold w*C + c.
    x = jnp.transpose(x_nchw, (0, 2, 3, 1)).reshape(N, H, WC)

    # Fold eval-mode BatchNorm into per-channel scale (into weights) + bias.
    s1 = params["gamma1"] * jax.lax.rsqrt(params["var1"] + eps)
    b1 = params["beta1"] - params["mean1"] * s1
    s2 = params["gamma2"] * jax.lax.rsqrt(params["var2"] + eps)
    b2 = params["beta2"] - params["mean2"] * s2

    # PyTorch OIHW -> HWIO, then fold scale and band over width, stack ky along K.
    w1 = jnp.transpose(params["w1"], (2, 3, 1, 0))
    w2 = jnp.transpose(params["w2"], (2, 3, 1, 0))
    m1 = _banded_weights(w1, s1, W, compute_dtype)     # (3*W*C, W*C)
    m2 = _banded_weights(w2, s2, W, compute_dtype)     # (3*W*C, W*C)
    b1row = jnp.tile(b1, W).reshape(1, WC).astype(jnp.float32)  # lane = w*Cout + co
    b2row = jnp.tile(b2, W).reshape(1, WC).astype(jnp.float32)

    out = pl.pallas_call(
        resblock_kernel,
        out_shape=jax.ShapeDtypeStruct((N, H, WC), jnp.float32),
        grid_spec=pltpu.PrefetchScalarGridSpec(
            num_scalar_prefetch=0,
            grid=grid,
            in_specs=[
                pl.BlockSpec((NB, H, WC), lambda n: (n, 0, 0)),     # x (NB images/step)
                pl.BlockSpec((3 * WC, WC), lambda n: (0, 0)),       # m1 (grid-invariant)
                pl.BlockSpec((1, WC), lambda n: (0, 0)),            # b1
                pl.BlockSpec((3 * WC, WC), lambda n: (0, 0)),       # m2 (grid-invariant)
                pl.BlockSpec((1, WC), lambda n: (0, 0)),            # b2
            ],
            out_specs=pl.BlockSpec((NB, H, WC), lambda n: (n, 0, 0)),
        ),
        compiler_params=pltpu.CompilerParams(
            dimension_semantics=("parallel",),   # batch steps split across TCs (v7x)
            vmem_limit_bytes=32 * 1024 * 1024,
        ),
    )(x, m1, b1row, m2, b2row)

    # (N, H, W*C) -> NCHW
    return jnp.transpose(out.reshape(N, H, W, C), (0, 3, 1, 2))


def reference(x_nchw, params, eps=1e-5):
    """Pure-JAX reference matching the PyTorch forward (eval-mode BN)."""
    dn = ("NCHW", "OIHW", "NCHW")

    def conv(x, w):
        return jax.lax.conv_general_dilated(
            x, w, window_strides=(1, 1), padding=((1, 1), (1, 1)),
            dimension_numbers=dn, precision=jax.lax.Precision.HIGHEST)

    def bn(x, g, b, m, v):
        g, b, m, v = (t[None, :, None, None] for t in (g, b, m, v))
        return (x - m) / jnp.sqrt(v + eps) * g + b

    h = jax.nn.relu(bn(conv(x_nchw, params["w1"]),
                       params["gamma1"], params["beta1"],
                       params["mean1"], params["var1"]))
    out = bn(conv(h, params["w2"]),
             params["gamma2"], params["beta2"],
             params["mean2"], params["var2"])
    return jax.nn.relu(out + x_nchw)


def make_params(key, cin, cout):
    ks = jax.random.split(key, 10)
    return {
        "w1": jax.random.normal(ks[0], (cout, cin, 3, 3), jnp.float32) * 0.1,
        "gamma1": 1.0 + 0.1 * jax.random.normal(ks[1], (cout,), jnp.float32),
        "beta1": 0.1 * jax.random.normal(ks[2], (cout,), jnp.float32),
        "mean1": 0.1 * jax.random.normal(ks[3], (cout,), jnp.float32),
        "var1": 0.5 + jax.random.uniform(ks[4], (cout,), jnp.float32),
        "w2": jax.random.normal(ks[5], (cout, cout, 3, 3), jnp.float32) * 0.1,
        "gamma2": 1.0 + 0.1 * jax.random.normal(ks[6], (cout,), jnp.float32),
        "beta2": 0.1 * jax.random.normal(ks[7], (cout,), jnp.float32),
        "mean2": 0.1 * jax.random.normal(ks[8], (cout,), jnp.float32),
        "var2": 0.5 + jax.random.uniform(ks[9], (cout,), jnp.float32),
    }


if __name__ == "__main__":
    key = jax.random.PRNGKey(0)
    kx, kp = jax.random.split(key)

    # inchannel == outchannel, stride=1; W*C = 128 -> fully lane-dense.
    # N=16 so NB=8 images/step (M = NB*H = 128 MXU rows) and the grid keeps 2 steps.
    N, C, H, W = 16, 8, 16, 16
    x = jax.random.normal(kx, (N, C, H, W), jnp.float32)
    params = make_params(kp, C, C)

    ref = jax.block_until_ready(reference(x, params))

    # f32 MXU operands (multi-pass): tight parity with the f32 reference.
    out_f32 = jax.block_until_ready(
        residual_block_toy(x, params, compute_dtype=jnp.float32))
    assert out_f32.shape == (N, C, H, W)
    assert jnp.allclose(out_f32, ref, rtol=1e-3, atol=1e-3), (
        f"f32 max abs err = {jnp.max(jnp.abs(out_f32 - ref))}")

    # bf16 MXU operands, f32 accumulation: recommended perf config (v6e/v7x).
    out_bf16 = jax.block_until_ready(
        residual_block_toy(x, params, compute_dtype=jnp.bfloat16))
    assert out_bf16.shape == (N, C, H, W)
    assert jnp.allclose(out_bf16, ref, rtol=5e-2, atol=5e-2), (
        f"bf16 max abs err = {jnp.max(jnp.abs(out_bf16 - ref))}")

    print("KERNEL_OK")
</pallas_src>

<mosaic_0001>
module attributes {stable_mosaic.version = 11 : i64} {
  func.func @resblock_kernel(%arg0: i32, %arg1: memref<8x16x128xf32, #tpu.memory_space<vmem>>, %arg2: memref<384x128xf32, #tpu.memory_space<vmem>>, %arg3: memref<1x128xf32, #tpu.memory_space<vmem>>, %arg4: memref<384x128xf32, #tpu.memory_space<vmem>>, %arg5: memref<1x128xf32, #tpu.memory_space<vmem>>, %arg6: memref<8x16x128xf32, #tpu.memory_space<vmem>>) attributes {dimension_semantics = [#tpu.dimension_semantics<parallel>], iteration_bounds = array<i64: 2>, scalar_prefetch = 0 : i64, scratch_operands = 0 : i64, tpu.core_type = #tpu.core_type<tc>, window_params = [{transform_indices = @transform_0, window_bounds = array<i64: 8, 16, 128>}, {pipeline_mode = #tpu.pipeline_mode<synchronous>, transform_indices = @transform_1, window_bounds = array<i64: 384, 128>}, {pipeline_mode = #tpu.pipeline_mode<synchronous>, transform_indices = @transform_2, window_bounds = array<i64: 1, 128>}, {pipeline_mode = #tpu.pipeline_mode<synchronous>, transform_indices = @transform_3, window_bounds = array<i64: 384, 128>}, {pipeline_mode = #tpu.pipeline_mode<synchronous>, transform_indices = @transform_4, window_bounds = array<i64: 1, 128>}, {transform_indices = @transform_5, window_bounds = array<i64: 8, 16, 128>}]} {
    %c0 = arith.constant 0 : index
    %c0_0 = arith.constant 0 : index
    %c0_1 = arith.constant 0 : index
    %0 = vector.load %arg1[%c0, %c0_0, %c0_1] : memref<8x16x128xf32, #tpu.memory_space<vmem>>, vector<8x16x128xf32>
    %1 = vector.shape_cast %0 : vector<8x16x128xf32> to vector<128x128xf32>
    %2 = tpu.iota {dimensions = array<i32: 0>} : vector<128x128xi32>
    %c16_i32 = arith.constant 16 : i32
    %c0_i32 = arith.constant 0 : i32
    %3 = arith.cmpi eq, %c16_i32, %c0_i32 : i32
    %c1_i32 = arith.constant 1 : i32
    %4 = arith.select %3, %c1_i32, %c16_i32 : i32
    %5 = vector.broadcast %4 : i32 to vector<128x128xi32>
    %6 = arith.remsi %2, %5 : vector<128x128xi32>
    %c0_i32_2 = arith.constant 0 : i32
    %7 = vector.broadcast %c0_i32_2 : i32 to vector<128x128xi32>
    %8 = arith.cmpi ne, %6, %7 : vector<128x128xi32>
    %c0_i32_3 = arith.constant 0 : i32
    %9 = vector.broadcast %c0_i32_3 : i32 to vector<128x128xi32>
    %10 = arith.cmpi slt, %6, %9 : vector<128x128xi32>
    %c0_i32_4 = arith.constant 0 : i32
    %11 = arith.cmpi slt, %4, %c0_i32_4 : i32
    %12 = vector.broadcast %11 : i1 to vector<128x128xi1>
    %13 = vector.broadcast %12 : vector<128x128xi1> to vector<128x128xi1>
    %14 = arith.xori %10, %13 : vector<128x128xi1>
    %15 = arith.andi %14, %8 : vector<128x128xi1>
    %16 = vector.broadcast %4 : i32 to vector<128x128xi32>
    %17 = arith.addi %6, %16 : vector<128x128xi32>
    %18 = arith.select %15, %17, %6 : vector<128x128xi1>, vector<128x128xi32>
    %c0_i32_5 = arith.constant 0 : i32
    %19 = vector.broadcast %c0_i32_5 : i32 to vector<128x128xi32>
    %20 = arith.cmpi ne, %18, %19 : vector<128x128xi32>
    %c15_i32 = arith.constant 15 : i32
    %21 = vector.broadcast %c15_i32 : i32 to vector<128x128xi32>
    %22 = arith.cmpi ne, %18, %21 : vector<128x128xi32>
    %c1_i32_6 = arith.constant 1 : i32
    %23 = tpu.dynamic_rotate %1 by %c1_i32_6 dim 0 : vector<128x128xf32>, i32 -> vector<128x128xf32>
    %cst = arith.constant 0.000000e+00 : f32
    %24 = vector.broadcast %cst : f32 to vector<128x128xf32>
    %25 = arith.select %20, %23, %24 : vector<128x128xi1>, vector<128x128xf32>
    %c127_i32 = arith.constant 127 : i32
    %26 = tpu.dynamic_rotate %1 by %c127_i32 dim 0 : vector<128x128xf32>, i32 -> vector<128x128xf32>
    %cst_7 = arith.constant 0.000000e+00 : f32
    %27 = vector.broadcast %cst_7 : f32 to vector<128x128xf32>
    %28 = arith.select %22, %26, %27 : vector<128x128xi1>, vector<128x128xf32>
    %29 = tpu.concatenate %25, %1, %28 in 1 : vector<128x128xf32>, vector<128x128xf32>, vector<128x128xf32> -> vector<128x384xf32>
    %c0_8 = arith.constant 0 : index
    %c0_9 = arith.constant 0 : index
    %30 = vector.load %arg2[%c0_8, %c0_9] : memref<384x128xf32, #tpu.memory_space<vmem>>, vector<384x128xf32>
    %cst_10 = arith.constant dense<0.000000e+00> : vector<128x128xf32>
    %31 = tpu.matmul %29, %30, %cst_10 {dimension_numbers = #tpu.dot_dimension_numbers<[1], [0], [0], [1], [0, 0, 1, 1], [], []>} : vector<128x384xf32>, vector<384x128xf32>, vector<128x128xf32> -> vector<128x128xf32>
    %c0_11 = arith.constant 0 : index
    %c0_12 = arith.constant 0 : index
    %32 = vector.load %arg3[%c0_11, %c0_12] : memref<1x128xf32, #tpu.memory_space<vmem>>, vector<1x128xf32>
    %33 = vector.broadcast %32 : vector<1x128xf32> to vector<128x128xf32>
    %34 = arith.addf %31, %33 : vector<128x128xf32>
    %cst_13 = arith.constant 0.000000e+00 : f32
    %35 = vector.broadcast %cst_13 : f32 to vector<128x128xf32>
    %36 = arith.maximumf %34, %35 : vector<128x128xf32>
    %c1_i32_14 = arith.constant 1 : i32
    %37 = tpu.dynamic_rotate %36 by %c1_i32_14 dim 0 : vector<128x128xf32>, i32 -> vector<128x128xf32>
    %cst_15 = arith.constant 0.000000e+00 : f32
    %38 = vector.broadcast %cst_15 : f32 to vector<128x128xf32>
    %39 = arith.select %20, %37, %38 : vector<128x128xi1>, vector<128x128xf32>
    %c127_i32_16 = arith.constant 127 : i32
    %40 = tpu.dynamic_rotate %36 by %c127_i32_16 dim 0 : vector<128x128xf32>, i32 -> vector<128x128xf32>
    %cst_17 = arith.constant 0.000000e+00 : f32
    %41 = vector.broadcast %cst_17 : f32 to vector<128x128xf32>
    %42 = arith.select %22, %40, %41 : vector<128x128xi1>, vector<128x128xf32>
    %43 = tpu.concatenate %39, %36, %42 in 1 : vector<128x128xf32>, vector<128x128xf32>, vector<128x128xf32> -> vector<128x384xf32>
    %c0_18 = arith.constant 0 : index
    %c0_19 = arith.constant 0 : index
    %44 = vector.load %arg4[%c0_18, %c0_19] : memref<384x128xf32, #tpu.memory_space<vmem>>, vector<384x128xf32>
    %cst_20 = arith.constant dense<0.000000e+00> : vector<128x128xf32>
    %45 = tpu.matmul %43, %44, %cst_20 {dimension_numbers = #tpu.dot_dimension_numbers<[1], [0], [0], [1], [0, 0, 1, 1], [], []>} : vector<128x384xf32>, vector<384x128xf32>, vector<128x128xf32> -> vector<128x128xf32>
    %c0_21 = arith.constant 0 : index
    %c0_22 = arith.constant 0 : index
    %46 = vector.load %arg5[%c0_21, %c0_22] : memref<1x128xf32, #tpu.memory_space<vmem>>, vector<1x128xf32>
    %47 = vector.broadcast %46 : vector<1x128xf32> to vector<128x128xf32>
    %48 = arith.addf %45, %47 : vector<128x128xf32>
    %49 = arith.addf %48, %1 : vector<128x128xf32>
    %cst_23 = arith.constant 0.000000e+00 : f32
    %50 = vector.broadcast %cst_23 : f32 to vector<128x128xf32>
    %51 = arith.maximumf %49, %50 : vector<128x128xf32>
    %52 = vector.shape_cast %51 : vector<128x128xf32> to vector<8x16x128xf32>
    %c0_24 = arith.constant 0 : index
    %c0_25 = arith.constant 0 : index
    %c0_26 = arith.constant 0 : index
    %53 = vector.load %arg6[%c0_24, %c0_25, %c0_26] : memref<8x16x128xf32, #tpu.memory_space<vmem>>, vector<8x16x128xf32>
    tpu.vector_store %arg6[%c0_24, %c0_25, %c0_26], %52 {strides = array<i32>} : memref<8x16x128xf32, #tpu.memory_space<vmem>>, vector<8x16x128xf32>,
    return
  }
  func.func @transform_0(%arg0: i32) -> (i32, i32, i32) {
    %c0_i32 = arith.constant 0 : i32
    %c0_i32_0 = arith.constant 0 : i32
    %c0_i32_1 = arith.constant 0 : i32
    return %arg0, %c0_i32, %c0_i32_0 : i32, i32, i32
  }
  func.func @transform_1(%arg0: i32) -> (i32, i32) {
    %c0_i32 = arith.constant 0 : i32
    %c0_i32_0 = arith.constant 0 : i32
    %c0_i32_1 = arith.constant 0 : i32
    return %c0_i32, %c0_i32_0 : i32, i32
  }
  func.func @transform_2(%arg0: i32) -> (i32, i32) {
    %c0_i32 = arith.constant 0 : i32
    %c0_i32_0 = arith.constant 0 : i32
    %c0_i32_1 = arith.constant 0 : i32
    return %c0_i32, %c0_i32_0 : i32, i32
  }
  func.func @transform_3(%arg0: i32) -> (i32, i32) {
    %c0_i32 = arith.constant 0 : i32
    %c0_i32_0 = arith.constant 0 : i32
    %c0_i32_1 = arith.constant 0 : i32
    return %c0_i32, %c0_i32_0 : i32, i32
  }
  func.func @transform_4(%arg0: i32) -> (i32, i32) {
    %c0_i32 = arith.constant 0 : i32
    %c0_i32_0 = arith.constant 0 : i32
    %c0_i32_1 = arith.constant 0 : i32
    return %c0_i32, %c0_i32_0 : i32, i32
  }
  func.func @transform_5(%arg0: i32) -> (i32, i32, i32) {
    %c0_i32 = arith.constant 0 : i32
    %c0_i32_0 = arith.constant 0 : i32
    %c0_i32_1 = arith.constant 0 : i32
    return %arg0, %c0_i32, %c0_i32_0 : i32, i32, i32
  }
}

</mosaic_0001>

<bundles_post_ra>
// kernel: tpu_custom_call.1
= control target key start
LH: loop header
LB: loop body
LE: loop exit
PB: predicated region body
PF: predicated region fallthrough
CT: control target
= control target key end

     0   :  { %10 = vsyncpa [#allocation3], 0  ;;  %s3259_s0 = inlined_call_operand.hbm [shape: f32[16,16,128], index: 0, kind: input, shape index: {}]   ;;  %s3260_s1 = inlined_call_operand.hbm [shape: f32[384,128], index: 1, kind: input, shape index: {}]   ;;  %s3261_s2 = inlined_call_operand.vmem [shape: f32[1,128], index: 2, kind: input, shape index: {}]   ;;  %s3262_s3 = inlined_call_operand.hbm [shape: f32[384,128], index: 3, kind: input, shape index: {}]   ;;  %s3263_s4 = inlined_call_operand.vmem [shape: f32[1,128], index: 4, kind: input, shape index: {}]   ;;  %s3264_s5 = inlined_call_operand.hbm [shape: f32[16,16,128], index: 5, kind: output, shape index: {}]  }
   0x1   :  { %12 = vsyncpa [#allocation3 + $0x1], 0 }
   0x2   :  { %13 = vsyncpa [#allocation6], 0 }
   0x3   :  { %14 = vsyncpa [#allocation4], 0 }
   0x4   :  { %16 = vsyncpa [#allocation4 + $0x1], 0  ;;  %s2392_s18 = smov 0   ;;  %s2394_s19 = smov 0  }
   0x5   :  { %s2396_s20 = smov 0   ;;  %s2398_s21 = smov 0  }
   0x6 LB: > { %s2413_s22 = sadd.s32 4294967295, %s2352_s21   ;;  %s1587_s23 = sadd.s32 4294967294, %s2352_s21   ;;  %s2352_s21 = sphi %s2398_s21, %s3348_s21   ;;  %s2348_s20 = sphi %s2396_s20, %s3347_s20   ;;  %s2344_s19 = sphi %s2394_s19, %s3346_s19   ;;  %s2340_s18 = sphi %s2392_s18, %s3345_s18  }
   0x7   : > { %p42_p0 = scmp.ne.s32.totalorder %s2344_s19, %s2340_s18  ;;  %p3265_p1 = scmp.eq.s32.totalorder %s2413_s22, 0 }
   0x8   : > { %p156_p3 = scmp.eq.s32.totalorder %s1587_s23, 1  ;;  %p1588_p5 = scmp.ge.s32.totalorder %s2352_s21, 1 }
   0x9   : > { %p2422_p4 = por %p3265_p1, %p42_p0  ;;  %p163_p7 = scmp.lt.s32.totalorder %s2352_s21, 3 }
   0xa   : > { %p2427_p6 = por %p156_p3, %p42_p0  ;;  %s2354_s27 = smov [#allocation5]  }
   0xb   : > { %s3272_s24 = scalar_select %p2422_p4, 1, 0 }
   0xc   : > { %s3273_s25 = scalar_select %p2427_p6, 1, 0 }
   0xd   : > { %p2432_p8 = pnand %p1588_p5, %p163_p7  ;;  %s175_s28 = sshll.u32 %s2354_s27, 4  ;;  %s2436_s28 = int_to_ptr.vmem [resolvable:$true] %s175_s28 }
   0xe   : > { %s2355_s30 = smov [#allocation7]   ;;  %s2196_s9 = scalar_lea.hbm %s3260_s1, 6144 }
   0xf   : > { %p2121_p9 = pneg %p2432_p8  ;;  %s191_s6 = sshll.u32 %s2355_s30, 4  ;;  %s2447_s6 = int_to_ptr.vmem [resolvable:$true] %s191_s6 }
  0x10   : > { %p2197_p12 = scmp.ne.s32.totalorder %s3260_s1, %s2196_s9  ;;  %p2203_p5 = scmp.lt.u32.totalorder %s2196_s9, %s3260_s1 }
  0x11   : > { %p2443_p11 = pnand %p2121_p9, %p3265_p1 }
  0x13   : > { %p2198_p13 = pneg %p2443_p11 }
  0x15   : > { %p2199_p0 = pnand %p2198_p13, %p2197_p12 }
  0x17   : > { %p2200_p3 = pneg %p2199_p0 }
  0x19   : > { %p2205_p7 = pnand %p2203_p5, %p2200_p3 }
  0x1b   : > { %2208 = shalt.err (!%p2205_p7)
}
  0x1c   : > { %s2209_s14 = scalar_lea.vmem %s2436_s28, 6144  ;;  %p2217_p2 = scmp.lt.s32.totalorder %s2436_s28, %s2436_s28 }
  0x1d   : > { %p2210_p9 = scmp.ne.s32.totalorder %s2436_s28, %s2209_s14  ;;  %p2218_p12 = scmp.lt.s32.totalorder %s2209_s14, %s2209_s14 }
  0x1f   : > { %p2212_p10 = pnand %p2210_p9, %p2198_p13  ;;  %p2219_p0 = por %p2218_p12, %p2217_p2 }
  0x21   : > { %p2213_p1 = pneg %p2212_p10 }
  0x23   : > { %p2220_p6 = pnand %p2219_p0, %p2213_p1 }
  0x25   : > { %2223 = shalt.err (!%p2220_p6)
}
  0x26   : > { %s2356_s15 = smov 128   ;;  %s2357_s16 = smov 8  }
  0x27   : > { %2124 = dma.hbm_to_vmem [thread:$0]  (!%p2443_p11), %s3260_s1, 6144, %s2436_s28, [#allocation6], %s2356_s15, %s2356_s15, %s2357_s16  }
  0x28   : > { %s2224_s7 = scalar_lea.hbm %s3262_s3, 6144 }
  0x29   : > { %p2225_p1 = scmp.ne.s32.totalorder %s3262_s3, %s2224_s7  ;;  %p2231_p10 = scmp.lt.u32.totalorder %s2224_s7, %s3262_s3 }
  0x2b   : > { %p2227_p2 = pnand %p2225_p1, %p2198_p13 }
  0x2d   : > { %p2228_p6 = pneg %p2227_p2 }
  0x2f   : > { %p2233_p3 = pnand %p2231_p10, %p2228_p6 }
  0x31   : > { %2236 = shalt.err (!%p2233_p3)
}
  0x32   : > { %s2237_s28 = scalar_lea.vmem %s2447_s6, 6144  ;;  %p2245_p12 = scmp.lt.s32.totalorder %s2447_s6, %s2447_s6 }
  0x33   : > { %p2238_p5 = scmp.ne.s32.totalorder %s2447_s6, %s2237_s28  ;;  %p2246_p0 = scmp.lt.s32.totalorder %s2237_s28, %s2237_s28 }
  0x35   : > { %p2240_p7 = pnand %p2238_p5, %p2198_p13  ;;  %p2247_p1 = por %p2246_p0, %p2245_p12 }
  0x37   : > { %p2241_p9 = pneg %p2240_p7 }
  0x39   : > { %p2248_p2 = pnand %p2247_p1, %p2241_p9 }
  0x3b   : > { %2251 = shalt.err (!%p2248_p2)
}
  0x3c   : > { %2127 = dma.hbm_to_vmem [thread:$0]  (!%p2443_p11), %s3262_s3, 6144, %s2447_s6, [#allocation6], %s2356_s15, %s2356_s15, %s2357_s16  }
  0x3d   : > { %s2508_s29 = sadd.s32 1, %s2352_s21   ;;  %s29_s14 = sadd.s32 1, %s2348_s20 }
  0x3e   : > { %s26_s17 = ssub.s32 %s2352_s21, %s2508_s29  ;;  %p36_p13 = scmp.ne.s32.totalorder %s2348_s20, %s2344_s19 }
  0x3f   : > { %p27_p6 = scmp.eq.s32.totalorder %s26_s17, 0  ;;  %p37_p10 = scmp.eq.s32.totalorder %s2352_s21, 0 }
  0x40   : > { %p3276_p3 = scmp.eq.s32.totalorder %s2413_s22, 1  ;;  %p2138_p7 = scmp.lt.s32.totalorder %s2352_s21, 2 }
  0x41   : > { %s2524_s27 = scalar_select %p27_p6, %s2348_s20, %s29_s14  }
  0x42   : > { %p2518_p5 = por %p3276_p3, %p36_p13  ;;  %p38_p9 = por %p37_p10, %p36_p13 }
  0x43   : > { %s208_s30 = sand.u32 1, %s2348_s20   ;;  %s1642_s6 = sshll.u32 %s2352_s21, 11 }
  0x44   : > { %s3277_s23 = scalar_select %p2518_p5, 1, 0 }
  0x45   : > { %s1592_s7 = sshll.u32 %s208_s30, 7  ;;  %s2531_s10 = scalar_lea.hbm %s3259_s0, %s1642_s6 }
  0x46   : > { %s212_s11 = scalar_lea.vmem [#allocation2], %s1592_s7  ;;  %p2535_p11 = pnand %p2138_p7, %p38_p9 }
  0x47   : > { %s220_s28 = sshll.u32 %s212_s11, 4  ;;  %s2539_s13 = scalar_lea.sflag [#allocation3], %s208_s30  ;;  %s2533_s28 = int_to_ptr.vmem [resolvable:$true] %s220_s28 }
  0x48   : > { %s2252_s14 = scalar_lea.hbm %s2531_s10, 2048  ;;  %p2254_p0 = pneg %p2535_p11 }
  0x49   : > { %p2253_p12 = scmp.ne.s32.totalorder %s2531_s10, %s2252_s14  ;;  %s2257_s6 = scalar_lea.hbm %s3259_s0, 4096 }
  0x4a   : > { %p2258_p13 = scmp.lt.u32.totalorder %s2531_s10, %s3259_s0  ;;  %p2259_p6 = scmp.lt.u32.totalorder %s2257_s6, %s2252_s14 }
  0x4b   : > { %p2255_p1 = pnand %p2254_p0, %p2253_p12  ;;  %p2261_p3 = scmp.lt.u32.totalorder %s2252_s14, %s2531_s10 }
  0x4c   : > { %p2260_p10 = por %p2259_p6, %p2258_p13 }
  0x4d   : > { %p2256_p2 = pneg %p2255_p1 }
  0x4e   : > { %p2262_p7 = por %p2261_p3, %p2260_p10 }
  0x50   : > { %p2263_p9 = pnand %p2262_p7, %p2256_p2 }
  0x52   : > { %2266 = shalt.err (!%p2263_p9)
}
  0x53   : > { %s2267_s30 = scalar_lea.vmem %s2533_s28, 2048  ;;  %s2358_s11 = smov [#allocation2]  }
  0x54   : > { %p2268_p12 = scmp.ne.s32.totalorder %s2533_s28, %s2267_s30  ;;  %s2272_s17 = sshll.u32 %s2358_s11, 4  ;;  %s2273_s17 = int_to_ptr.vmem [resolvable:$false] %s2272_s17 }
  0x55   : > { %s2274_s7 = scalar_lea.vmem %s2273_s17, 4096  ;;  %p2275_p4 = scmp.lt.s32.totalorder %s2533_s28, %s2273_s17 }
  0x56   : > { %p2270_p1 = pnand %p2268_p12, %p2254_p0  ;;  %p2276_p13 = scmp.lt.s32.totalorder %s2274_s7, %s2267_s30 }
  0x58   : > { %p2271_p5 = pneg %p2270_p1  ;;  %p2277_p6 = por %p2276_p13, %p2275_p4 }
  0x5a   : > { %p2278_p10 = pnand %p2277_p6, %p2271_p5 }
  0x5c   : > { %2281 = shalt.err (!%p2278_p10)
}
  0x5d   : > { %2131 = dma.hbm_to_vmem [thread:$0]  (!%p2535_p11), %s2531_s10, 2048, %s2533_s28, %s2539_s13, %s2356_s15, %s2356_s15, %s2357_s16  }
  0x5e   : > { %232 = sbr.rel (%p2432_p8) target bundleno = 722 (0x2d2), region = 40  ;;  %s2573_s14 = sand.u32 (!%p2432_p8), 1, %s2344_s19  }
  0x5f   : > { %s1597_s6 = sshll.u32 (!%p2432_p8), %s2573_s14, 7  ;;  %s235_s8 = scalar_lea.sflag (!%p2432_p8), [#allocation3], %s2573_s14 }
  0x60   : > { %s2579_s12 = scalar_lea.vmem (!%p2432_p8), [#allocation2], %s1597_s6  ;;  %p3279_p4 = scmp.ne.s32.totalorder (!%p2432_p8), %s3272_s24, 0 }
  0x65   : > { %2327 = dma.done.wait (%p3279_p4), %s235_s8, 2048  }
  0x66   : > { %2329 = vsyncadd (%p3279_p4), %s235_s8, 4294965248  ;;  %p3280_p5 = scmp.eq.s32.totalorder %s2413_s22, 0 }
  0x68   : > { %2331 = dma.done.wait (%p3280_p5), [#allocation6], 12288   ;;  %p3281_p8 = pmov %p3280_p5 }
  0x69   : > { %v646_v0 = vld [vmem:[#allocation5 + $0x80] sm:$0xff]  ;;  %v647_v1 = vld [vmem:[#allocation5 + $0x88] sm:$0xff]  ;;  %v648_v5 = vld [vmem:[#allocation5 + $0x90] sm:$0xff]  ;;  %v291_v36 = vlaneseq  ;;  %s3150_s10 = scalar_lea.vmem [#allocation8], %s1597_s6  ;;  %s1644_s28 = sshll.u32 %s2413_s22, 11 }
  0x6a   : > { %2333 = vsyncadd (%p3281_p8), [#allocation6], 4294955008  ;;  %v630_v2 = vld [vmem:[#allocation5] sm:$0xff]  ;;  %v1981_v3 = vpack.c.bf16 %v647_v1, %v646_v0  ;;  %v631_v4 = vld [vmem:[#allocation5 + $0x8] sm:$0xff]  ;;  %s1495_s13 = sshll.u32 %s3150_s10, 4  ;;  %s3212_s11 = scalar_lea.hbm %s3264_s5, %s1644_s28  ;;  %s3214_s13 = int_to_ptr.vmem [resolvable:$true] %s1495_s13 }
  0x6b   : > { %v649_v6 = vld [vmem:[#allocation5 + $0x98] sm:$0xff]  ;;  %v1983_v7 = vpack.c.bf16 %v631_v4, %v630_v2  ;;  %v662_v9 = vld [vmem:[#allocation5 + $0x100] sm:$0xff]  ;;  %v663_v10 = vld [vmem:[#allocation5 + $0x108] sm:$0xff]  ;;  %v2589_v46 = vshrl.u32 %v291_v36, 7  ;;  %s1481_s17 = scalar_lea.sflag [#allocation4], %s2573_s14  ;;  %s2282_s7 = scalar_lea.vmem %s3214_s13, 2048 }
  0x6c   : > { %v1985_v8 = vpack.c.bf16 %v649_v6, %v648_v5  ;;  %v632_v11 = vld [vmem:[#allocation5 + $0x10] sm:$0xff]  ;;  %1982 = vmatprep.subr.bf16.mxu0 %v1981_v3  ;;  %v2013_v12 = vpack.c.bf16 %v663_v10, %v662_v9  ;;  %v633_v13 = vld [vmem:[#allocation5 + $0x18] sm:$0xff]  ;;  %v650_v14 = vld [vmem:[#allocation5 + $0xa0] sm:$0xff]  ;;  %p2283_p11 = scmp.ne.s32.totalorder %s3214_s13, %s2282_s7  ;;  %p3342_p0 = scmp.ne.s32.totalorder %s3277_s23, 0 }
  0x6d   : > { %v651_v15 = vld [vmem:[#allocation5 + $0xa8] sm:$0xff]  ;;  %1984 = vmatpush3.bf16.msra.mxu0 %v1983_v7  ;;  %v1987_v16 = vpack.c.bf16 %v633_v13, %v632_v11  ;;  %v664_v17 = vld [vmem:[#allocation5 + $0x110] sm:$0xff]  ;;  %v665_v18 = vld [vmem:[#allocation5 + $0x118] sm:$0xff]  ;;  %vm3268_vm0 = vcmp.lt.s32.totalorder %v2589_v46, 7  ;;  %vm3270_vm1 = vcmp.lt.s32.totalorder %v2589_v46, 1  ;;  %s2359_s22 = smov [#allocation8]  }
  0x6e   : > { %1986 = vmatprep.subr.bf16.mxu0 %v1985_v8  ;;  %2014 = vmatprep.subr.bf16.mxu1 %v2013_v12  ;;  %v1989_v19 = vpack.c.bf16 %v651_v15, %v650_v14  ;;  %v2017_v20 = vpack.c.bf16 %v665_v18, %v664_v17  ;;  %v634_v21 = vld [vmem:[#allocation5 + $0x20] sm:$0xff]  ;;  %v635_v22 = vld [vmem:[#allocation5 + $0x28] sm:$0xff]  ;;  %v652_v23 = vld [vmem:[#allocation5 + $0xb0] sm:$0xff]  ;;  %v293_v14 = vadd.s32 8, %v2589_v46  ;;  %p2284_p2 = pnand %p2283_p11, %p3342_p0  ;;  %s2286_s6 = sshll.u32 %s2359_s22, 4  ;;  %s2287_s6 = int_to_ptr.vmem [resolvable:$false] %s2286_s6 }
  0x6f   : > { %2016 = vmatpush3.bf16.msra.mxu1 %v2013_v12  ;;  %v653_v24 = vld [vmem:[#allocation5 + $0xb8] sm:$0xff]  ;;  %v666_v25 = vld [vmem:[#allocation5 + $0x120] sm:$0xff]  ;;  %v667_v26 = vld [vmem:[#allocation5 + $0x128] sm:$0xff]  ;;  %v1991_v28 = vpack.c.bf16 %v635_v22, %v634_v21  ;;  %s2288_s8 = scalar_lea.vmem %s2287_s6, 4096  ;;  %p2289_p7 = scmp.lt.s32.totalorder %s3214_s13, %s2287_s6 }
  0x70   : > { %2018 = vmatprep.subr.bf16.mxu1 %v2017_v20  ;;  %v2021_v27 = vpack.c.bf16 %v667_v26, %v666_v25  ;;  %v668_v29 = vld [vmem:[#allocation5 + $0x130] sm:$0xff]  ;;  %v669_v30 = vld [vmem:[#allocation5 + $0x138] sm:$0xff]  ;;  %v1993_v31 = vpack.c.bf16 %v653_v24, %v652_v23  ;;  %v654_v34 = vld [vmem:[#allocation5 + $0xc0] sm:$0xff]  ;;  %v319_v24 = vand.u32 15, %v293_v14  ;;  %v295_v26 = vadd.s32 24, %v2589_v46  ;;  %p2285_p3 = pneg %p2284_p2  ;;  %p2290_p9 = scmp.lt.s32.totalorder %s2288_s8, %s2282_s7 }
  0x71   : > { %1988 = vmatpush3.bf16.msra.mxu0 %v1987_v16  ;;  %v636_v32 = vld [vmem:[#allocation5 + $0x30] sm:$0xff]  ;;  %v637_v33 = vld [vmem:[#allocation5 + $0x38] sm:$0xff]  ;;  %v655_v35 = vld [vmem:[#allocation5 + $0xc8] sm:$0xff]  ;;  %v2025_v37 = vpack.c.bf16 %v669_v30, %v668_v29 }
  0x72   : > { %1990 = vmatprep.subr.bf16.mxu0 %v1989_v19  ;;  %v1995_v38 = vpack.c.bf16 %v637_v33, %v636_v32  ;;  %v670_v39 = vld [vmem:[#allocation5 + $0x140] sm:$0xff]  ;;  %v671_v40 = vld [vmem:[#allocation5 + $0x148] sm:$0xff]  ;;  %v1997_v41 = vpack.c.bf16 %v655_v35, %v654_v34  ;;  %v656_v44 = vld [vmem:[#allocation5 + $0xd0] sm:$0xff]  ;;  %v312_v19 = vand.u32 15, %v2589_v46  ;;  %v294_v35 = vadd.s32 16, %v2589_v46  ;;  %p2291_p12 = por %p2290_p9, %p2289_p7 }
  0x73   : > { %2020 = vmatpush3.bf16.msra.mxu1 %v2017_v20  ;;  %v638_v42 = vld [vmem:[#allocation5 + $0x40] sm:$0xff]  ;;  %v639_v43 = vld [vmem:[#allocation5 + $0x48] sm:$0xff]  ;;  %v657_v45 = vld [vmem:[#allocation5 + $0xd8] sm:$0xff]  ;;  %v2029_v47 = vpack.c.bf16 %v671_v40, %v670_v39  ;;  %vm2641_vm3 = vcmp.ne.s32.totalorder %v319_v24, 15 }
  0x74   : > { %2022 = vmatprep.subr.bf16.mxu1 %v2021_v27  ;;  %v2592_v48 = vld [vmem:[%s2579_s12] sm:$0xff]  ;;  %v1999_v49 = vpack.c.bf16 %v639_v43, %v638_v42  ;;  %v672_v50 = vld [vmem:[#allocation5 + $0x150] sm:$0xff]  ;;  %v673_v51 = vld [vmem:[#allocation5 + $0x158] sm:$0xff]  ;;  %v2001_v54 = vpack.c.bf16 %v657_v45, %v656_v44  ;;  %vm2627_vm2 = vcmp.ne.s32.totalorder %v312_v19, 0  ;;  %p2292_p1 = pnand %p2291_p12, %p2285_p3 }
  0x75   : > { %1992 = vmatpush3.bf16.msra.mxu0 %v1991_v28  ;;  %749 = vmatprep.mubr.f32.mxu0 %v2592_v48  ;;  %v2596_v52 = vld [vmem:[%s2579_s12 + $0x8] sm:$0xff]  ;;  %v581_v53 = vrot.slane %v2592_v48, 1  ;;  %v640_v55 = vld [vmem:[#allocation5 + $0x50] sm:$0xff]  ;;  %v641_v56 = vld [vmem:[#allocation5 + $0x58] sm:$0xff]  ;;  %v2033_v60 = vpack.c.bf16 %v673_v51, %v672_v50  ;;  %v532_v18 = vrot.slane %v2592_v48, 7  ;;  %v326_v51 = vand.u32 15, %v294_v35 }
  0x76   : > { %1994 = vmatprep.subr.bf16.mxu0 %v1993_v31  ;;  %v582_v57 = vrot.slane %v2596_v52, 1  ;;  %v658_v58 = vld [vmem:[#allocation5 + $0xe0] sm:$0xff]  ;;  %v659_v59 = vld [vmem:[#allocation5 + $0xe8] sm:$0xff]  ;;  %v2003_v62 = vpack.c.bf16 %v641_v56, %v640_v55  ;;  %v660_v4 = vld [vmem:[#allocation5 + $0xf0] sm:$0xff]  ;;  %v533_v34 = vrot.slane %v2596_v52, 7 }
  0x77   : > { %2024 = vmatpush3.bf16.msra.mxu1 %v2021_v27  ;;  %v674_v63 = vld [vmem:[#allocation5 + $0x160] sm:$0xff]  ;;  %v675_v0 = vld [vmem:[#allocation5 + $0x168] sm:$0xff]  ;;  %v2005_v1 = vpack.c.bf16 %v659_v59, %v658_v58  ;;  %v661_v5 = vld [vmem:[#allocation5 + $0xf8] sm:$0xff]  ;;  %vm2682_vm5 = vcmp.ne.s32.totalorder %v326_v51, 0 }
  0x78   : > { %2026 = vmatprep.subr.bf16.mxu1 %v2025_v37  ;;  %v612_v61 = vsel %vm3268_vm0, %v581_v53, %v582_v57  ;;  %v642_v2 = vld [vmem:[#allocation5 + $0x60] sm:$0xff]  ;;  %v643_v3 = vld [vmem:[#allocation5 + $0x68] sm:$0xff]  ;;  %v2037_v6 = vpack.c.bf16 %v675_v0, %v674_v63  ;;  %v676_v8 = vld [vmem:[#allocation5 + $0x170] sm:$0xff]  ;;  %v2009_v10 = vpack.c.bf16 %v661_v5, %v660_v4  ;;  %v563_v50 = vsel %vm3270_vm1, %v532_v18, %v533_v34 }
  0x79   : > { %1996 = vmatpush3.bf16.msra.mxu0 %v1995_v38  ;;  %1901 = vmatprep.mubr.f32.mxu1 %v612_v61  ;;  %v2007_v7 = vpack.c.bf16 %v643_v3, %v642_v2  ;;  %v677_v9 = vld [vmem:[#allocation5 + $0x178] sm:$0xff]  ;;  %v644_v11 = vld [vmem:[#allocation5 + $0x70] sm:$0xff]  ;;  %v1119_v22 = vld [vmem:[#allocation7 + $0x100] sm:$0xff]  ;;  %v296_v3 = vadd.s32 32, %v2589_v46 }
  0x7a   : > { %1998 = vmatprep.subr.bf16.mxu0 %v1997_v41  ;;  %v645_v12 = vld [vmem:[#allocation5 + $0x78] sm:$0xff]  ;;  %v2041_v15 = vpack.c.bf16 %v677_v9, %v676_v8  ;;  %v2612_v16 = vld [vmem:[%s2579_s12 + $0x10] sm:$0xff]  ;;  %v1120_v23 = vld [vmem:[#allocation7 + $0x108] sm:$0xff]  ;;  %v333_v41 = vand.u32 15, %v295_v26  ;;  %v301_v9 = vadd.s32 72, %v2589_v46 }
  0x7b   : > { %2028 = vmatpush3.bf16.msra.mxu1 %v2025_v37  ;;  %v2608_v13 = vld [vmem:[%s2579_s12 + $0x78] sm:$0xff]  ;;  %v2011_v17 = vpack.c.bf16 %v645_v12, %v644_v11  ;;  %v583_v25 = vrot.slane %v2612_v16, 1  ;;  %v1121_v27 = vld [vmem:[#allocation7 + $0x110] sm:$0xff]  ;;  %v2625_v30 = vld [vmem:[%s2579_s12 + $0x20] sm:$0xff]  ;;  %v2077_v31 = vpack.c.bf16 %v1120_v23, %v1119_v22  ;;  %v297_v37 = vadd.s32 40, %v2589_v46 }
  0x7c   : > { %2030 = vmatprep.subr.bf16.mxu1 %v2029_v47  ;;  %v547_v20 = vrot.slane %v2608_v13, 7  ;;  %v2618_v21 = vld [vmem:[%s2579_s12 + $0x18] sm:$0xff]  ;;  %v2638_v36 = vld [vmem:[%s2579_s12 + $0x28] sm:$0xff]  ;;  %v585_v42 = vrot.slane %v2625_v30, 1  ;;  %v1123_v43 = vld [vmem:[#allocation7 + $0x120] sm:$0xff]  ;;  %vm2667_vm4 = vcmp.ne.s32.totalorder %v333_v41, 15 }
  0x7d   : > { %2000 = vmatpush3.bf16.msra.mxu0 %v1999_v49  ;;  %v1122_v28 = vld [vmem:[#allocation7 + $0x118] sm:$0xff]  ;;  %v584_v29 = vrot.slane %v2618_v21, 1  ;;  %v611_v40 = vsel %vm3268_vm0, %v582_v57, %v583_v25  ;;  %v1124_v44 = vld [vmem:[#allocation7 + $0x128] sm:$0xff]  ;;  %v2656_v49 = vld [vmem:[%s2579_s12 + $0x30] sm:$0xff]  ;;  %v347_v56 = vand.u32 15, %v297_v37  ;;  %v535_v2 = vrot.slane %v2618_v21, 7 }
  0x7e   : > { %2002 = vmatprep.subr.bf16.mxu0 %v2001_v54  ;;  %v564_v33 = vsel %vm3270_vm1, %v547_v20, %v532_v18  ;;  %v2081_v38 = vpack.c.bf16 %v1122_v28, %v1121_v27  ;;  %v534_v54 = vrot.slane %v2612_v16, 7  ;;  %v2663_v55 = vld [vmem:[%s2579_s12 + $0x38] sm:$0xff]  ;;  %v2085_v57 = vpack.c.bf16 %v1124_v44, %v1123_v43  ;;  %v2679_v63 = vld [vmem:[%s2579_s12 + $0x40] sm:$0xff]  ;;  %v2691_v4 = vld [vmem:[%s2579_s12 + $0x48] sm:$0xff] }
  0x7f   : > { %2032 = vmatpush3.bf16.msra.mxu1 %v2029_v47  ;;  %v610_v45 = vsel %vm3268_vm0, %v583_v25, %v584_v29  ;;  %v586_v47 = vrot.slane %v2638_v36, 1  ;;  %v609_v58 = vsel %vm3268_vm0, %v584_v29, %v585_v42  ;;  %v587_v59 = vrot.slane %v2656_v49, 1  ;;  %v2709_v12 = vld [vmem:[%s2579_s12 + $0x50] sm:$0xff]  ;;  %v2732_v26 = vld [vmem:[%s2579_s12 + $0x60] sm:$0xff] }
  0x80   : > { %2034 = vmatprep.subr.bf16.mxu1 %v2033_v60  ;;  %vm2695_vm6 = vcmp.ne.s32.totalorder %v347_v56, 15  ;;  %v589_v8 = vrot.slane %v2679_v63, 1  ;;  %v590_v11 = vrot.slane %v2691_v4, 1  ;;  %v561_v14 = vsel %vm3270_vm1, %v534_v54, %v535_v2 }
  0x81   : > { %2004 = vmatpush3.bf16.msra.mxu0 %v2003_v62  ;;  %v608_v61 = vsel %vm3268_vm0, %v585_v42, %v586_v47  ;;  %v588_v62 = vrot.slane %v2663_v55, 1  ;;  %v303_v18 = vadd.s32 88, %v2589_v46  ;;  %v375_v22 = vand.u32 15, %v301_v9  ;;  %v2762_v42 = vld [vmem:[%s2579_s12 + $0x70] sm:$0xff] }
  0x82   : > { %2006 = vmatprep.subr.bf16.mxu0 %v2005_v1  ;;  %v562_v1 = vsel %vm3270_vm1, %v533_v34, %v534_v54  ;;  %v591_v23 = vrot.slane %v2709_v12, 1  ;;  %v604_v24 = vsel %vm3268_vm0, %v589_v8, %v590_v11  ;;  %v537_v29 = vrot.slane %v2638_v36, 7 }
  0x83   : > { %2036 = vmatpush3.bf16.msra.mxu1 %v2033_v60  ;;  %v299_v60 = vadd.s32 56, %v2589_v46  ;;  %v389_v34 = vand.u32 15, %v303_v18  ;;  %vm2748_vm9 = vcmp.ne.s32.totalorder %v375_v22, 15  ;;  %v593_v37 = vrot.slane %v2732_v26, 1 }
  0x84   : > { %2038 = vmatprep.subr.bf16.mxu1 %v2037_v6  ;;  %v603_v35 = vsel %vm3268_vm0, %v590_v11, %v591_v23  ;;  %v307_v54 = vadd.s32 120, %v2589_v46  ;;  %v541_v11 = vrot.slane %v2691_v4, 7  ;;  %v544_v22 = vrot.slane %v2732_v26, 7 }
  0x85   : > { %2008 = vmatpush3.bf16.msra.mxu0 %v2007_v7  ;;  %v361_v7 = vand.u32 15, %v299_v60  ;;  %vm2770_vm10 = vcmp.ne.s32.totalorder %v389_v34, 15  ;;  %v539_v60 = vrot.slane %v2663_v55, 7 }
  0x86   : > { %2010 = vmatprep.subr.bf16.mxu0 %v2009_v10  ;;  %v606_v10 = vsel %vm3268_vm0, %v587_v59, %v588_v62 }
  0x87   : > { %2040 = vmatpush3.bf16.msra.mxu1 %v2037_v6  ;;  %v607_v6 = vsel %vm3268_vm0, %v586_v47, %v587_v59  ;;  %vm2721_vm7 = vcmp.ne.s32.totalorder %v361_v7, 15  ;;  %v540_v7 = vrot.slane %v2679_v63, 7 }
  0x88   : > { %2042 = vmatprep.subr.bf16.mxu1 %v2041_v15 }
  0x89   : > { %2012 = vmatpush3.bf16.msra.mxu0 %v2011_v17  ;;  %v2716_v17 = vld [vmem:[%s2579_s12 + $0x58] sm:$0xff]  ;;  %v555_v48 = vsel %vm3270_vm1, %v540_v7, %v541_v11 }
  0x8a   : > { %2078 = vmatprep.subr.bf16.mxu0 %v2077_v31  ;;  %v592_v25 = vrot.slane %v2716_v17, 1  ;;  %v543_v18 = vrot.slane %v2716_v17, 7 }
  0x8b   : > { %2044 = vmatpush3.bf16.msra.mxu1 %v2041_v15  ;;  %v340_v15 = vand.u32 15, %v296_v3 }
  0x8c   : > { %1602 = vmatmul.mubr.msk.f32.vlgmr.msra.gmra.mrb[0].mxu0 %vm2627_vm2, %v564_v33  ;;  %v2744_v33 = vld [vmem:[%s2579_s12 + $0x68] sm:$0xff] }
  0x8d   : > { %754 = vmatprep.mubr.f32.mxu0 %v2596_v52  ;;  %2080 = vmatpush3.bf16.msra.mxu0 %v2077_v31  ;;  %vm2735_vm8 = vcmp.ne.s32.totalorder %v340_v15, 0  ;;  %v298_v31 = vadd.s32 48, %v2589_v46  ;;  %v594_v41 = vrot.slane %v2744_v33, 1  ;;  %v3308_v15 = vmov 0 }
  0x8e   : > { %1902 = vmatmul.mubr.msk.f32.vlgmr.msra.gmra.mrb[0].mxu1 %vm2641_vm3, %v611_v40  ;;  %2082 = vmatprep.subr.bf16.mxu0 %v2081_v38  ;;  %v602_v40 = vsel %vm3268_vm0, %v591_v23, %v592_v25 }
  0x8f   : > { %1904 = vmatprep.mubr.f32.mxu1 %v610_v45  ;;  %v354_v44 = vand.u32 15, %v298_v31  ;;  %v538_v45 = vrot.slane %v2656_v49, 7  ;;  %v600_v56 = vsel %vm3268_vm0, %v593_v37, %v594_v41  ;;  %v3312_v31 = vmov 0 }
  0x90   : > { %755 = vmatmul.mubr.f32.gmra.mrb[2].mxu0 %v563_v50  ;;  %v601_v50 = vsel %vm3268_vm0, %v592_v25, %v593_v37  ;;  %v545_v25 = vrot.slane %v2744_v33, 7  ;;  %v1126_v37 = vld [vmem:[#allocation7 + $0x138] sm:$0xff] }
  0x91   : > { %759 = vmatprep.mubr.f32.mxu0 %v2612_v16  ;;  %2084 = vmatpush3.bf16.msra.mxu0 %v2081_v38  ;;  %v536_v16 = vrot.slane %v2625_v30, 7  ;;  %v305_v38 = vadd.s32 104, %v2589_v46  ;;  %vm2782_vm11 = vcmp.ne.s32.totalorder %v354_v44, 0  ;;  %v558_v59 = vsel %vm3270_vm1, %v537_v29, %v538_v45  ;;  %v1130_v44 = vld [vmem:[#allocation7 + $0x158] sm:$0xff] }
  0x92   : > { %1905 = vmatmul.mubr.msk.f32.gmra.mrb[2].mxu1 %vm2667_vm4, %v609_v58  ;;  %2086 = vmatprep.subr.bf16.mxu0 %v2085_v57  ;;  %v557_v3 = vsel %vm3270_vm1, %v538_v45, %v539_v60 }
  0x93   : > { %1907 = vmatprep.mubr.f32.mxu1 %v608_v61  ;;  %v560_v28 = vsel %vm3270_vm1, %v535_v2, %v536_v16  ;;  %v559_v43 = vsel %vm3270_vm1, %v536_v16, %v537_v29  ;;  %v403_v51 = vand.u32 15, %v305_v38  ;;  %v300_v61 = vadd.s32 64, %v2589_v46 }
  0x94   : > { %1603 = vmatmul.mubr.msk.f32.gmra.mrb[4].mxu0 %vm2682_vm5, %v562_v1  ;;  %v417_v1 = vand.u32 15, %v307_v54  ;;  %v546_v29 = vrot.slane %v2762_v42, 7 }
  0x95   : > { %764 = vmatprep.mubr.f32.mxu0 %v2618_v21  ;;  %2088 = vmatpush3.bf16.msra.mxu0 %v2085_v57  ;;  %v605_v21 = vsel %vm3268_vm0, %v588_v62, %v589_v8  ;;  %v596_v57 = vrot.slane %v2608_v13, 1  ;;  %vm2792_vm12 = vcmp.ne.s32.totalorder %v403_v51, 15 }
  0x96   : > { %1908 = vmatmul.mubr.msk.f32.gmra.mrb[4].mxu1 %vm2695_vm6, %v607_v6  ;;  %v368_v6 = vand.u32 15, %v300_v61  ;;  %vm2808_vm13 = vcmp.ne.s32.totalorder %v417_v1, 15  ;;  %v550_v34 = vsel %vm3270_vm1, %v545_v25, %v546_v29  ;;  %v1088_v61 = vld [vmem:[#allocation7 + $0x8] sm:$0xff]  ;;  %v1105_v1 = vld [vmem:[#allocation7 + $0x90] sm:$0xff] }
  0x97   : > { %1910 = vmatprep.mubr.f32.mxu1 %v606_v10  ;;  %v613_v9 = vsel %vm3268_vm0, %v596_v57, %v581_v53  ;;  %v556_v10 = vsel %vm3270_vm1, %v539_v60, %v540_v7  ;;  %v1087_v60 = vld [vmem:[#allocation7] sm:$0xff]  ;;  %v1090_v7 = vld [vmem:[#allocation7 + $0x18] sm:$0xff] }
  0x98   : > { %765 = vmatmul.mubr.f32.gmra.mrb[6].mxu0 %v561_v14  ;;  %vm2817_vm14 = vcmp.ne.s32.totalorder %v368_v6, 0  ;;  %v302_v14 = vadd.s32 80, %v2589_v46  ;;  %v1089_v6 = vld [vmem:[#allocation7 + $0x10] sm:$0xff] }
  0x99   : > { %769 = vmatprep.mubr.f32.mxu0 %v2625_v30 }
  0x9a   : > { %1911 = vmatmul.mubr.msk.f32.gmra.mrb[6].mxu1 %vm2721_vm7, %v605_v21  ;;  %v382_v53 = vand.u32 15, %v302_v14 }
  0x9b   : > { %1913 = vmatprep.mubr.f32.mxu1 %v604_v24  ;;  %v552_v24 = vsel %vm3270_vm1, %v543_v18, %v544_v22 }
  0x9c   : > { %1604 = vmatmul.mubr.msk.f32.gmra.mrb[8].mxu0 %vm2735_vm8, %v560_v28  ;;  %vm2834_vm15 = vcmp.ne.s32.totalorder %v382_v53, 0  ;;  %v551_v28 = vsel %vm3270_vm1, %v544_v22, %v545_v25  ;;  %v1092_v53 = vld [vmem:[#allocation7 + $0x28] sm:$0xff] }
  0x9d   : > { %774 = vmatprep.mubr.f32.mxu0 %v2638_v36  ;;  %v595_v36 = vrot.slane %v2762_v42, 1  ;;  %v3309_v15 = vsel %vm2834_vm15, 4294967295, %v3308_v15  ;;  %v1112_v25 = vld [vmem:[#allocation7 + $0xc8] sm:$0xff] }
  0x9e   : > { %1914 = vmatmul.mubr.msk.f32.gmra.mrb[8].mxu1 %vm2748_vm9, %v603_v35  ;;  %v1125_v35 = vld [vmem:[#allocation7 + $0x130] sm:$0xff] }
  0x9f   : > { %1916 = vmatprep.mubr.f32.mxu1 %v602_v40  ;;  %v598_v2 = vsel %vm3268_vm0, %v595_v36, %v596_v57  ;;  %v2089_v38 = vpack.c.bf16 %v1126_v37, %v1125_v35  ;;  %v1127_v40 = vld [vmem:[#allocation7 + $0x140] sm:$0xff]  ;;  %v1104_v57 = vld [vmem:[#allocation7 + $0x88] sm:$0xff]  ;;  %v1097_v37 = vld [vmem:[#allocation7 + $0x50] sm:$0xff] }
  0xa0   : > { %775 = vmatmul.mubr.f32.gmra.mrb[10].mxu0 %v559_v43  ;;  %v1129_v43 = vld [vmem:[#allocation7 + $0x150] sm:$0xff] }
  0xa1   : > { %779 = vmatprep.mubr.f32.mxu0 %v2656_v49  ;;  %v599_v49 = vsel %vm3268_vm0, %v594_v41, %v595_v36  ;;  %2090 = vmatprep.subr.bf16.mxu0 %v2089_v38  ;;  %v1128_v41 = vld [vmem:[#allocation7 + $0x148] sm:$0xff]  ;;  %v2097_v45 = vpack.c.bf16 %v1130_v44, %v1129_v43  ;;  %v1134_v36 = vld [vmem:[#allocation7 + $0x178] sm:$0xff]  ;;  %v1099_v44 = vld [vmem:[#allocation7 + $0x60] sm:$0xff] }
  0xa2   : > { %1917 = vmatmul.mubr.msk.f32.gmra.mrb[10].mxu1 %vm2770_vm10, %v601_v50  ;;  %2092 = vmatpush3.bf16.msra.mxu0 %v2089_v38  ;;  %v1132_v50 = vld [vmem:[#allocation7 + $0x168] sm:$0xff]  ;;  %v1098_v38 = vld [vmem:[#allocation7 + $0x58] sm:$0xff] }
  0xa3   : > { %1919 = vmatprep.mubr.f32.mxu1 %v600_v56  ;;  %v1103_v56 = vld [vmem:[#allocation7 + $0x80] sm:$0xff] }
  0xa4   : > { %1605 = vmatmul.mubr.msk.f32.gmra.mrb[12].mxu0 %vm2782_vm11, %v558_v59  ;;  %v2045_v59 = vpack.c.bf16 %v1104_v57, %v1103_v56 }
  0xa5   : > { %784 = vmatprep.mubr.f32.mxu0 %v2663_v55 }
  0xa6   : > { %1920 = vmatmul.mubr.msk.f32.gmra.mrb[12].mxu1 %vm2792_vm12, %v599_v49  ;;  %v2047_v49 = vpack.c.bf16 %v1088_v61, %v1087_v60  ;;  %2046 = vmatprep.subr.bf16.mxu1 %v2045_v59  ;;  %v2880_v60 = vld [vmem:[%s3261_s2] ss:$0 sm:$0xff] }
  0xa7   : > { %1922 = vmatprep.mubr.f32.mxu1 %v598_v2  ;;  %v1106_v2 = vld [vmem:[#allocation7 + $0x98] sm:$0xff] }
  0xa8   : > { %785 = vmatmul.mubr.f32.gmra.mrb[14].mxu0 %v557_v3  ;;  %2048 = vmatpush3.bf16.msra.mxu1 %v2047_v49  ;;  %v2049_v3 = vpack.c.bf16 %v1106_v2, %v1105_v1 }
  0xa9   : > { %789 = vmatprep.mubr.f32.mxu0 %v2679_v63  ;;  %v542_v63 = vrot.slane %v2709_v12, 7 }
  0xaa   : > { %1923 = vmatmul.mubr.msk.f32.gmra.mrb[14].mxu1 %vm2808_vm13, %v613_v9  ;;  %v2051_v9 = vpack.c.bf16 %v1090_v7, %v1089_v6  ;;  %2050 = vmatprep.subr.bf16.mxu1 %v2049_v3 }
  0xab   : > { %v554_v16 = vsel %vm3270_vm1, %v541_v11, %v542_v63  ;;  %v553_v21 = vsel %vm3270_vm1, %v542_v63, %v543_v18  ;;  %v1108_v11 = vld [vmem:[#allocation7 + $0xa8] sm:$0xff]  ;;  %v1110_v18 = vld [vmem:[#allocation7 + $0xb8] sm:$0xff] }
  0xac   : > { %1606 = vmatmul.mubr.msk.f32.gmra.mrb[16].mxu0 %vm2817_vm14, %v556_v10  ;;  %2052 = vmatpush3.bf16.msra.mxu1 %v2051_v9  ;;  %v1107_v10 = vld [vmem:[#allocation7 + $0xa0] sm:$0xff] }
  0xad   : > { %794 = vmatprep.mubr.f32.mxu0 %v2691_v4  ;;  %v304_v4 = vadd.s32 96, %v2589_v46  ;;  %v2053_v14 = vpack.c.bf16 %v1108_v11, %v1107_v10 }
  0xaf   : > { %2054 = vmatprep.subr.bf16.mxu1 %v2053_v14 }
  0xb0   : > { %795 = vmatmul.mubr.f32.gmra.mrb[18].mxu0 %v555_v48  ;;  %v1091_v48 = vld [vmem:[#allocation7 + $0x20] sm:$0xff] }
  0xb1   : > { %799 = vmatprep.mubr.f32.mxu0 %v2709_v12  ;;  %v396_v12 = vand.u32 15, %v304_v4  ;;  %v2055_v63 = vpack.c.bf16 %v1092_v53, %v1091_v48 }
  0xb3   : > { %vm2849_vm0 = vcmp.ne.s32.totalorder %v396_v12, 0  ;;  %2056 = vmatpush3.bf16.msra.mxu1 %v2055_v63  ;;  %v1094_v12 = vld [vmem:[#allocation7 + $0x38] sm:$0xff] }
  0xb4   : > { %1607 = vmatmul.mubr.msk.f32.gmra.mrb[20].mxu0 %vm2834_vm15, %v554_v16  ;;  %v1109_v16 = vld [vmem:[#allocation7 + $0xb0] sm:$0xff] }
  0xb5   : > { %804 = vmatprep.mubr.f32.mxu0 %v2716_v17  ;;  %v306_v17 = vadd.s32 112, %v2589_v46  ;;  %v2057_v4 = vpack.c.bf16 %v1110_v18, %v1109_v16 }
  0xb7   : > { %2058 = vmatprep.subr.bf16.mxu1 %v2057_v4 }
  0xb8   : > { %805 = vmatmul.mubr.f32.gmra.mrb[22].mxu0 %v553_v21  ;;  %v1093_v21 = vld [vmem:[#allocation7 + $0x30] sm:$0xff] }
  0xb9   : > { %809 = vmatprep.mubr.f32.mxu0 %v2732_v26  ;;  %v410_v26 = vand.u32 15, %v306_v17  ;;  %v2059_v22 = vpack.c.bf16 %v1094_v12, %v1093_v21 }
  0xbb   : > { %vm2864_vm15 = vcmp.ne.s32.totalorder %v410_v26, 0  ;;  %2060 = vmatpush3.bf16.msra.mxu1 %v2059_v22  ;;  %v1096_v26 = vld [vmem:[#allocation7 + $0x48] sm:$0xff] }
  0xbc   : > { %1608 = vmatmul.mubr.msk.f32.gmra.mrb[24].mxu0 %vm2849_vm0, %v552_v24  ;;  %v3313_v31 = vsel %vm2864_vm15, 4294967295, %v3312_v31  ;;  %v1111_v24 = vld [vmem:[#allocation7 + $0xc0] sm:$0xff] }
  0xbd   : > { %814 = vmatprep.mubr.f32.mxu0 %v2744_v33  ;;  %v549_v33 = vsel %vm3270_vm1, %v546_v29, %v547_v20  ;;  %v1133_v20 = vld [vmem:[#allocation7 + $0x170] sm:$0xff]  ;;  %v2061_v17 = vpack.c.bf16 %v1112_v25, %v1111_v24  ;;  %vm3314_vm1 = vcmp.lt.s32.totalorder %v2589_v46, 7 }
  0xbe   : > { %v2105_v54 = vpack.c.bf16 %v1134_v36, %v1133_v20  ;;  %v1101_v36 = vld [vmem:[#allocation7 + $0x70] sm:$0xff] }
  0xbf   : > { %2062 = vmatprep.subr.bf16.mxu1 %v2061_v17 }
  0xc0   : > { %815 = vmatmul.mubr.f32.gmra.mrb[26].mxu0 %v551_v28  ;;  %v1095_v28 = vld [vmem:[#allocation7 + $0x40] sm:$0xff] }
  0xc1   : > { %819 = vmatprep.mubr.f32.mxu0 %v2762_v42  ;;  %v2093_v42 = vpack.c.bf16 %v1128_v41, %v1127_v40  ;;  %v2063_v29 = vpack.c.bf16 %v1096_v26, %v1095_v28  ;;  %v2067_v40 = vpack.c.bf16 %v1098_v38, %v1097_v37  ;;  %v1115_v41 = vld [vmem:[#allocation7 + $0xe0] sm:$0xff] }
  0xc3   : > { %2094 = vmatprep.subr.bf16.mxu0 %v2093_v42  ;;  %2064 = vmatpush3.bf16.msra.mxu1 %v2063_v29 }
  0xc4   : > { %1609 = vmatmul.mubr.msk.f32.gmra.mrb[28].mxu0 %vm2864_vm15, %v550_v34  ;;  %v1113_v34 = vld [vmem:[#allocation7 + $0xd0] sm:$0xff]  ;;  %vm3315_vm15 = vcmp.lt.s32.totalorder %v2589_v46, 1 }
  0xc5   : > { %824 = vmatprep.mubr.f32.mxu0 %v2608_v13  ;;  %2096 = vmatpush3.bf16.msra.mxu0 %v2093_v42  ;;  %v1131_v13 = vld [vmem:[#allocation7 + $0x160] sm:$0xff]  ;;  %v1116_v42 = vld [vmem:[#allocation7 + $0xe8] sm:$0xff] }
  0xc6   : > { %2098 = vmatprep.subr.bf16.mxu0 %v2097_v45  ;;  %v2101_v51 = vpack.c.bf16 %v1132_v50, %v1131_v13  ;;  %v2069_v43 = vpack.c.bf16 %v1116_v42, %v1115_v41  ;;  %v1117_v50 = vld [vmem:[#allocation7 + $0xf0] sm:$0xff] }
  0xc8   : > { %825 = vmatmul.mubr.f32.gmra.mrb[30].mxu0 %v549_v33  ;;  %v1114_v33 = vld [vmem:[#allocation7 + $0xd8] sm:$0xff] }
  0xc9   : > { %2100 = vmatpush3.bf16.msra.mxu0 %v2097_v45  ;;  %v2065_v35 = vpack.c.bf16 %v1114_v33, %v1113_v34  ;;  %v1100_v45 = vld [vmem:[#allocation7 + $0x68] sm:$0xff] }
  0xca   : > { %2102 = vmatprep.subr.bf16.mxu0 %v2101_v51  ;;  %v2071_v13 = vpack.c.bf16 %v1100_v45, %v1099_v44 }
  0xcb   : > { %2066 = vmatprep.subr.bf16.mxu1 %v2065_v35 }
  0xcc   : > { %2068 = vmatpush3.bf16.msra.mxu1 %v2067_v40 }
  0xcd   : > { %2104 = vmatpush3.bf16.msra.mxu0 %v2101_v51  ;;  %2070 = vmatprep.subr.bf16.mxu1 %v2069_v43  ;;  %v1118_v51 = vld [vmem:[#allocation7 + $0xf8] sm:$0xff] }
  0xce   : > { %2106 = vmatprep.subr.bf16.mxu0 %v2105_v54  ;;  %v2073_v20 = vpack.c.bf16 %v1118_v51, %v1117_v50 }
  0xd0   : > { %2072 = vmatpush3.bf16.msra.mxu1 %v2071_v13 }
  0xd1   : > { %2108 = vmatpush3.bf16.msra.mxu0 %v2105_v54  ;;  %v1102_v54 = vld [vmem:[#allocation7 + $0x78] sm:$0xff]  ;;  %2074 = vmatprep.subr.bf16.mxu1 %v2073_v20 }
  0xd2   : > { %v2075_v56 = vpack.c.bf16 %v1102_v54, %v1101_v36 }
  0xd4   : > { %2076 = vmatpush3.bf16.msra.mxu1 %v2075_v56 }
 0x15f   : > { %v1677_v57 = vpop.f32.mrb[0].mxu0 }
 0x160   : > { %v1678_v59 = vpop.f32.mrb[1].mxu0 }
 0x161   : > { %v1679_v61 = vadd.f32 %v1678_v59, %v1677_v57  ;;  %v1903_v49 = vpop.f32.mrb[0].mxu1 }
 0x162   : > { %v896_v1 = vpop.f32.mrb[1].mxu1 }
 0x163   : > { %v1680_v2 = vpop.f32.mrb[2].mxu0  ;;  %v752_v3 = vadd.f32 %v1679_v61, %v2880_v60 }
 0x164   : > { %v1681_v6 = vpop.f32.mrb[3].mxu0 }
 0x165   : > { %v1682_v7 = vadd.f32 %v1681_v6, %v1680_v2  ;;  %v897_v9 = vadd.f32 %v896_v1, %v752_v3  ;;  %v1906_v10 = vpop.f32.mrb[2].mxu1 }
 0x166   : > { %v906_v11 = vpop.f32.mrb[3].mxu1 }
 0x167   : > { %v757_v14 = vadd.f32 %v1682_v7, %v2880_v60  ;;  %v2884_v48 = vmax.f32 %v897_v9, 0.0  ;;  %v1683_v53 = vpop.f32.mrb[4].mxu0 }
 0x168   : > { %v1684_v63 = vpop.f32.mrb[5].mxu0 }
 0x169   : > { %v902_v16 = vadd.f32 %v1903_v49, %v757_v14  ;;  %v1685_v18 = vadd.f32 %v1684_v63, %v1683_v53  ;;  %1206 = vmatprep.mubr.f32.mxu1 %v2884_v48  ;;  %v1909_v4 = vpop.f32.mrb[4].mxu1  ;;  %v991_v25 = vrot.slane %v2884_v48, 7  ;;  %v1039_v17 = vrot.slane %v2884_v48, 1 }
 0x16a   : > { %v916_v21 = vpop.f32.mrb[5].mxu1 }
 0x16b   : > { %v2887_v12 = vmax.f32 %v902_v16, 0.0  ;;  %v1686_v22 = vpop.f32.mrb[6].mxu0  ;;  %v762_v24 = vadd.f32 %v1685_v18, %v2880_v60 }
 0x16c   : > { %v1687_v28 = vpop.f32.mrb[7].mxu0 }
 0x16d   : > { %v1688_v26 = vadd.f32 %v1687_v28, %v1686_v22  ;;  %v907_v29 = vadd.f32 %v906_v11, %v762_v24  ;;  %v1040_v34 = vrot.slane %v2887_v12, 1  ;;  %v1912_v33 = vpop.f32.mrb[6].mxu1  ;;  %v992_v35 = vrot.slane %v2887_v12, 7 }
 0x16e   : > { %v926_v37 = vpop.f32.mrb[7].mxu1 }
 0x16f   : > { %v767_v38 = vadd.f32 %v1688_v26, %v2880_v60  ;;  %v2895_v40 = vmax.f32 %v907_v29, 0.0  ;;  %v1689_v41 = vpop.f32.mrb[8].mxu0  ;;  %v1069_v42 = vsel %vm3314_vm1, %v1039_v17, %v1040_v34  ;;  %v2905_v43 = vsel %vm3315_vm15, %v991_v25, %v992_v35 }
 0x170   : > { %v1690_v44 = vpop.f32.mrb[9].mxu0  ;;  %1957 = vmatprep.mubr.f32.mxu0 %v1069_v42 }
 0x171   : > { %v912_v45 = vadd.f32 %v1906_v10, %v767_v38  ;;  %v993_v13 = vrot.slane %v2895_v40, 7  ;;  %v1041_v50 = vrot.slane %v2895_v40, 1  ;;  %v1691_v51 = vadd.f32 %v1690_v44, %v1689_v41  ;;  %v2909_v20 = vpop.f32.mrb[8].mxu1 }
 0x172   : > { %v936_v36 = vpop.f32.mrb[9].mxu1 }
 0x173   : > { %v2911_v54 = vmax.f32 %v912_v45, 0.0  ;;  %v1692_v56 = vpop.f32.mrb[10].mxu0  ;;  %v772_v57 = vadd.f32 %v1691_v51, %v2880_v60  ;;  %v1068_v59 = vsel %vm3314_vm1, %v1040_v34, %v1041_v50  ;;  %v2918_v61 = vsel %vm3315_vm15, %v992_v35, %v993_v13 }
 0x174   : > { %v1693_v49 = vpop.f32.mrb[11].mxu0  ;;  %1958 = vmatmul.mubr.msk.f32.vlgmr.msra.gmra.mrb[32].mxu0 %vm2641_vm3, %v1068_v59  ;;  %vm3316_vm3 = vmmov %vm3315_vm15 }
 0x175   : > { %v1694_v1 = vadd.f32 %v1693_v49, %v1692_v56  ;;  %v917_v2 = vadd.f32 %v916_v21, %v772_v57  ;;  %v1042_v3 = vrot.slane %v2911_v54, 1  ;;  %v2923_v6 = vpop.f32.mrb[10].mxu1  ;;  %v994_v7 = vrot.slane %v2911_v54, 7  ;;  %vm3317_vm15 = vmmov %vm3314_vm1 }
 0x176   : > { %v2926_v9 = vpop.f32.mrb[11].mxu1 }
 0x177   : > { %v777_v10 = vadd.f32 %v1694_v1, %v2880_v60  ;;  %v2929_v11 = vmax.f32 %v917_v2, 0.0  ;;  %v1695_v14 = vpop.f32.mrb[12].mxu0  ;;  %v1067_v53 = vsel %vm3314_vm1, %v1041_v50, %v1042_v3  ;;  %v2935_v39 = vsel %vm3316_vm3, %v993_v13, %v994_v7  ;;  %vm3318_vm1 = vmmov %vm3316_vm3 }
 0x178   : > { %v1696_v63 = vpop.f32.mrb[13].mxu0  ;;  %1960 = vmatprep.mubr.f32.mxu0 %v1067_v53  ;;  %vm3319_vm3 = vmmov %vm3317_vm15 }
 0x179   : > { %v922_v16 = vadd.f32 %v1909_v4, %v777_v10  ;;  %v995_v18 = vrot.slane %v2929_v11, 7  ;;  %v1043_v21 = vrot.slane %v2929_v11, 1  ;;  %v1697_v22 = vadd.f32 %v1696_v63, %v1695_v14  ;;  %v2939_v24 = vpop.f32.mrb[12].mxu1 }
 0x17a   : > { %v2941_v28 = vpop.f32.mrb[13].mxu1 }
 0x17b   : > { %v2943_v26 = vmax.f32 %v922_v16, 0.0  ;;  %v1698_v29 = vpop.f32.mrb[14].mxu0  ;;  %v782_v34 = vadd.f32 %v1697_v22, %v2880_v60  ;;  %v1066_v35 = vsel %vm3317_vm15, %v1042_v3, %v1043_v21  ;;  %v2950_v4 = vsel %vm3318_vm1, %v994_v7, %v995_v18  ;;  %vm3321_vm15 = vmmov %vm3319_vm3 }
 0x17c   : > { %v1699_v38 = vpop.f32.mrb[15].mxu0  ;;  %1961 = vmatmul.mubr.msk.f32.gmra.mrb[34].mxu0 %vm2667_vm4, %v1066_v35  ;;  %vm3320_vm4 = vmmov %vm3318_vm1 }
 0x17d   : > { %v1700_v41 = vadd.f32 %v1699_v38, %v1698_v29  ;;  %v927_v42 = vadd.f32 %v926_v37, %v782_v34  ;;  %v1044_v44 = vrot.slane %v2943_v26, 1  ;;  %v2955_v45 = vpop.f32.mrb[14].mxu1  ;;  %v996_v13 = vrot.slane %v2943_v26, 7 }
 0x17e   : > { %v2958_v50 = vpop.f32.mrb[15].mxu1 }
 0x17f   : > { %v787_v51 = vadd.f32 %v1700_v41, %v2880_v60  ;;  %v2961_v56 = vmax.f32 %v927_v42, 0.0  ;;  %v1701_v57 = vpop.f32.mrb[16].mxu0  ;;  %v1065_v59 = vsel %vm3319_vm3, %v1043_v21, %v1044_v44  ;;  %v2967_v52 = vsel %vm3320_vm4, %v995_v18, %v996_v13  ;;  %vm3322_vm4 = vmmov %vm3318_vm1 }
 0x180   : > { %v1702_v37 = vpop.f32.mrb[17].mxu0  ;;  %1963 = vmatprep.mubr.f32.mxu0 %v1065_v59 }
 0x181   : > { %v932_v49 = vadd.f32 %v1912_v33, %v787_v51  ;;  %v997_v1 = vrot.slane %v2961_v56, 7  ;;  %v1045_v2 = vrot.slane %v2961_v56, 1  ;;  %v1703_v3 = vadd.f32 %v1702_v37, %v1701_v57 }
 0x183   : > { %v2971_v7 = vmax.f32 %v932_v49, 0.0  ;;  %v1704_v10 = vpop.f32.mrb[18].mxu0  ;;  %v792_v14 = vadd.f32 %v1703_v3, %v2880_v60  ;;  %v1064_v53 = vsel %vm3321_vm15, %v1044_v44, %v1045_v2  ;;  %v2978_v63 = vsel %vm3318_vm1, %v996_v13, %v997_v1  ;;  %vm3324_vm15 = vmmov %vm3318_vm1 }
 0x184   : > { %v1705_v16 = vpop.f32.mrb[19].mxu0  ;;  %1964 = vmatmul.mubr.msk.f32.gmra.mrb[36].mxu0 %vm2695_vm6, %v1064_v53  ;;  %vm3323_vm6 = vmmov %vm3319_vm3 }
 0x185   : > { %v1706_v33 = vadd.f32 %v1705_v16, %v1704_v10  ;;  %v937_v18 = vadd.f32 %v936_v36, %v792_v14  ;;  %v1046_v21 = vrot.slane %v2971_v7, 1  ;;  %v998_v22 = vrot.slane %v2971_v7, 7  ;;  %vm3325_vm1 = vmmov %vm3319_vm3 }
 0x187   : > { %v797_v29 = vadd.f32 %v1706_v33, %v2880_v60  ;;  %v2985_v34 = vmax.f32 %v937_v18, 0.0  ;;  %v1707_v35 = vpop.f32.mrb[20].mxu0  ;;  %v1063_v38 = vsel %vm3319_vm3, %v1045_v2, %v1046_v21  ;;  %v2991_v41 = vsel %vm3322_vm4, %v997_v1, %v998_v22  ;;  %vm3326_vm3 = vmmov %vm3322_vm4 }
 0x188   : > { %v1708_v5 = vpop.f32.mrb[21].mxu0  ;;  %1966 = vmatprep.mubr.f32.mxu0 %v1063_v38  ;;  %vm3328_vm4 = vmmov %vm3326_vm3 }
 0x189   : > { %v942_v36 = vadd.f32 %v2909_v20, %v797_v29  ;;  %v999_v42 = vrot.slane %v2985_v34, 7  ;;  %v1047_v44 = vrot.slane %v2985_v34, 1  ;;  %v1709_v13 = vadd.f32 %v1708_v5, %v1707_v35 }
 0x18b   : > { %v2996_v51 = vmax.f32 %v942_v36, 0.0  ;;  %v1710_v57 = vpop.f32.mrb[22].mxu0  ;;  %v802_v59 = vadd.f32 %v1709_v13, %v2880_v60  ;;  %v1062_v37 = vsel %vm3323_vm6, %v1046_v21, %v1047_v44  ;;  %v3003_v49 = vsel %vm3324_vm15, %v998_v22, %v999_v42  ;;  %vm3329_vm6 = vmmov %vm3325_vm1 }
 0x18c   : > { %v1711_v1 = vpop.f32.mrb[23].mxu0  ;;  %1967 = vmatmul.mubr.msk.f32.gmra.mrb[38].mxu0 %vm2721_vm7, %v1062_v37  ;;  %vm3327_vm7 = vmmov %vm3325_vm1 }
 0x18d   : > { %v1712_v20 = vadd.f32 %v1711_v1, %v1710_v57  ;;  %v947_v2 = vadd.f32 %v2926_v9, %v802_v59  ;;  %v1048_v3 = vrot.slane %v2996_v51, 1  ;;  %v1000_v10 = vrot.slane %v2996_v51, 7  ;;  %vm3330_vm15 = vmmov %vm3326_vm3 }
 0x18f   : > { %v807_v14 = vadd.f32 %v1712_v20, %v2880_v60  ;;  %v3011_v53 = vmax.f32 %v947_v2, 0.0  ;;  %v1713_v16 = vpop.f32.mrb[24].mxu0  ;;  %v1061_v33 = vsel %vm3325_vm1, %v1047_v44, %v1048_v3  ;;  %v3017_v18 = vsel %vm3326_vm3, %v999_v42, %v1000_v10 }
 0x190   : > { %v1714_v19 = vpop.f32.mrb[25].mxu0  ;;  %1969 = vmatprep.mubr.f32.mxu0 %v1061_v33 }
 0x191   : > { %v952_v9 = vadd.f32 %v2923_v6, %v807_v14  ;;  %v1001_v21 = vrot.slane %v3011_v53, 7  ;;  %v1049_v22 = vrot.slane %v3011_v53, 1  ;;  %v1715_v29 = vadd.f32 %v1714_v19, %v1713_v16 }
 0x193   : > { %v3022_v35 = vmax.f32 %v952_v9, 0.0  ;;  %v1716_v38 = vpop.f32.mrb[26].mxu0  ;;  %v812_v5 = vadd.f32 %v1715_v29, %v2880_v60  ;;  %v1060_v36 = vsel %vm3327_vm7, %v1048_v3, %v1049_v22  ;;  %v3029_v42 = vsel %vm3328_vm4, %v1000_v10, %v1001_v21 }
 0x194   : > { %v1717_v44 = vpop.f32.mrb[27].mxu0  ;;  %1970 = vmatmul.mubr.msk.f32.gmra.mrb[40].mxu0 %vm2748_vm9, %v1060_v36  ;;  %vm3331_vm9 = vmmov %vm3325_vm1 }
 0x195   : > { %v1718_v6 = vadd.f32 %v1717_v44, %v1716_v38  ;;  %v957_v13 = vadd.f32 %v2941_v28, %v812_v5  ;;  %v1050_v57 = vrot.slane %v3022_v35, 1  ;;  %v1002_v59 = vrot.slane %v3022_v35, 7  ;;  %vm3332_vm1 = vmmov %vm3326_vm3 }
 0x196   : > { %vm3333_vm3 = vmmov %vm3329_vm6 }
 0x197   : > { %v817_v37 = vadd.f32 %v1718_v6, %v2880_v60  ;;  %v3037_v1 = vmax.f32 %v957_v13, 0.0  ;;  %v1719_v20 = vpop.f32.mrb[28].mxu0  ;;  %v1059_v2 = vsel %vm3329_vm6, %v1049_v22, %v1050_v57  ;;  %v1011_v3 = vsel %vm3330_vm15, %v1001_v21, %v1002_v59  ;;  %vm3334_vm7 = vmmov %vm3332_vm1 }
 0x198   : > { %v1720_v30 = vpop.f32.mrb[29].mxu0  ;;  %1972 = vmatprep.mubr.f32.mxu0 %v1059_v2  ;;  %vm3336_vm4 = vmmov %vm3332_vm1 }
 0x199   : > { %v962_v10 = vadd.f32 %v2939_v24, %v817_v37  ;;  %v1003_v28 = vrot.slane %v3037_v1, 7  ;;  %v1051_v14 = vrot.slane %v3037_v1, 1  ;;  %v1721_v16 = vadd.f32 %v1720_v30, %v1719_v20  ;;  %vm3337_vm6 = vmmov %vm3332_vm1 }
 0x19a   : > { %vm3338_vm15 = vmmov %vm3333_vm3 }
 0x19b   : > { %v988_v33 = vmax.f32 %v962_v10, 0.0  ;;  %v1722_v19 = vpop.f32.mrb[30].mxu0  ;;  %v822_v9 = vadd.f32 %v1721_v16, %v2880_v60  ;;  %v1058_v29 = vsel %vm3331_vm9, %v1050_v57, %v1051_v14  ;;  %v1010_v22 = vsel %vm3332_vm1, %v1002_v59, %v1003_v28  ;;  %vm3339_vm9 = vmmov %vm3333_vm3 }
 0x19c   : > { %v1723_v21 = vpop.f32.mrb[31].mxu0  ;;  %1973 = vmatmul.mubr.msk.f32.gmra.mrb[42].mxu0 %vm2770_vm10, %v1058_v29  ;;  %vm3335_vm10 = vmmov %vm3333_vm3  ;;  %v2182_v29 = vld [vmem:[%s2579_s12 + $0x10] sm:$0xff] }
 0x19d   : > { %v1724_v24 = vadd.f32 %v1723_v21, %v1722_v19  ;;  %v967_v38 = vadd.f32 %v2958_v50, %v822_v9  ;;  %v1052_v5 = vrot.slane %v988_v33, 1  ;;  %v1004_v36 = vrot.slane %v988_v33, 7 }
 0x19f   : > { %v827_v44 = vadd.f32 %v1724_v24, %v2880_v60  ;;  %v989_v6 = vmax.f32 %v967_v38, 0.0  ;;  %v1057_v13 = vsel %vm3333_vm3, %v1051_v14, %v1052_v5  ;;  %v1009_v57 = vsel %vm3334_vm7, %v1003_v28, %v1004_v36 }
 0x1a0   : > { %1975 = vmatprep.mubr.f32.mxu0 %v1057_v13 }
 0x1a1   : > { %v972_v59 = vadd.f32 %v2955_v45, %v827_v44  ;;  %v1005_v37 = vrot.slane %v989_v6, 7  ;;  %v1053_v47 = vrot.slane %v989_v6, 1 }
 0x1a3   : > { %v990_v20 = vmax.f32 %v972_v59, 0.0  ;;  %v1056_v50 = vsel %vm3335_vm10, %v1052_v5, %v1053_v47  ;;  %v1008_v2 = vsel %vm3336_vm4, %v1004_v36, %v1005_v37 }
 0x1a4   : > { %1976 = vmatmul.mubr.msk.f32.gmra.mrb[44].mxu0 %vm2792_vm12, %v1056_v50 }
 0x1a5   : > { %v1006_v60 = vrot.slane %v990_v20, 7  ;;  %v1054_v30 = vrot.slane %v990_v20, 1 }
 0x1a7   : > { %v1022_v10 = vsel %vm3337_vm6, %v1006_v60, %v991_v25  ;;  %v1055_v45 = vsel %vm3338_vm15, %v1053_v47, %v1054_v30  ;;  %v1070_v28 = vsel %vm3339_vm9, %v1054_v30, %v1039_v17  ;;  %v1007_v14 = vsel %vm3332_vm1, %v1005_v37, %v1006_v60 }
 0x1a8   : > { %1619 = vmatmul.mubr.msk.f32.vlgmr.msra.gmra.mrb[16].mxu1 %vm2627_vm2, %v1022_v10  ;;  %1978 = vmatprep.mubr.f32.mxu0 %v1055_v45  ;;  %vm3340_vm2 = vnez %v3309_v15 }
 0x1a9   : > { %1211 = vmatprep.mubr.f32.mxu1 %v2887_v12  ;;  %1979 = vmatmul.mubr.msk.f32.gmra.mrb[46].mxu0 %vm2808_vm13, %v1070_v28 }
 0x1ac   : > { %1212 = vmatmul.mubr.f32.gmra.mrb[18].mxu1 %v2905_v43 }
 0x1ad   : > { %1216 = vmatprep.mubr.f32.mxu1 %v2895_v40  ;;  %v3139_v40 = vld [vmem:[%s3263_s4] ss:$0 sm:$0xff] }
 0x1b0   : > { %1620 = vmatmul.mubr.msk.f32.gmra.mrb[20].mxu1 %vm2682_vm5, %v2918_v61  ;;  %vm3341_vm5 = vnez %v3313_v31 }
 0x1b1   : > { %1221 = vmatprep.mubr.f32.mxu1 %v2911_v54 }
 0x1b4   : > { %1222 = vmatmul.mubr.f32.gmra.mrb[22].mxu1 %v2935_v39 }
 0x1b5   : > { %1226 = vmatprep.mubr.f32.mxu1 %v2929_v11 }
 0x1b8   : > { %1621 = vmatmul.mubr.msk.f32.gmra.mrb[24].mxu1 %vm2735_vm8, %v2950_v4 }
 0x1b9   : > { %1231 = vmatprep.mubr.f32.mxu1 %v2943_v26 }
 0x1bc   : > { %1232 = vmatmul.mubr.f32.gmra.mrb[26].mxu1 %v2967_v52 }
 0x1bd   : > { %1236 = vmatprep.mubr.f32.mxu1 %v2961_v56 }
 0x1c0   : > { %1622 = vmatmul.mubr.msk.f32.gmra.mrb[28].mxu1 %vm2782_vm11, %v2978_v63 }
 0x1c1   : > { %1241 = vmatprep.mubr.f32.mxu1 %v2971_v7  ;;  %v2180_v7 = vld [vmem:[%s2579_s12] sm:$0xff] }
 0x1c4   : > { %1242 = vmatmul.mubr.f32.gmra.mrb[30].mxu1 %v2991_v41 }
 0x1c5   : > { %1246 = vmatprep.mubr.f32.mxu1 %v2985_v34 }
 0x1c8   : > { %1623 = vmatmul.mubr.msk.f32.gmra.mrb[32].mxu1 %vm2817_vm14, %v3003_v49 }
 0x1c9   : > { %1251 = vmatprep.mubr.f32.mxu1 %v2996_v51 }
 0x1cc   : > { %1252 = vmatmul.mubr.f32.gmra.mrb[34].mxu1 %v3017_v18 }
 0x1cd   : > { %1256 = vmatprep.mubr.f32.mxu1 %v3011_v53 }
 0x1d0   : > { %1624 = vmatmul.mubr.msk.f32.gmra.mrb[36].mxu1 %vm3340_vm2, %v3029_v42 }
 0x1d1   : > { %1261 = vmatprep.mubr.f32.mxu1 %v3022_v35  ;;  %v2181_v35 = vld [vmem:[%s2579_s12 + $0x8] sm:$0xff] }
 0x1d4   : > { %1262 = vmatmul.mubr.f32.gmra.mrb[38].mxu1 %v1011_v3 }
 0x1d5   : > { %1266 = vmatprep.mubr.f32.mxu1 %v3037_v1 }
 0x1d8   : > { %1625 = vmatmul.mubr.msk.f32.gmra.mrb[40].mxu1 %vm2849_vm0, %v1010_v22 }
 0x1d9   : > { %1271 = vmatprep.mubr.f32.mxu1 %v988_v33 }
 0x1dc   : > { %1272 = vmatmul.mubr.f32.gmra.mrb[42].mxu1 %v1009_v57 }
 0x1dd   : > { %1276 = vmatprep.mubr.f32.mxu1 %v989_v6  ;;  %v2183_v6 = vld [vmem:[%s2579_s12 + $0x18] sm:$0xff] }
 0x1e0   : > { %1626 = vmatmul.mubr.msk.f32.gmra.mrb[44].mxu1 %vm3341_vm5, %v1008_v2  ;;  %v2184_v2 = vld [vmem:[%s2579_s12 + $0x20] sm:$0xff] }
 0x1e1   : > { %1281 = vmatprep.mubr.f32.mxu1 %v990_v20 }
 0x1e4   : > { %1282 = vmatmul.mubr.f32.gmra.mrb[46].mxu1 %v1007_v14 }
 0x247   : > { %v1959_v46 = vpop.f32.mrb[32].mxu0 }
 0x248   : > { %v1353_v32 = vpop.f32.mrb[33].mxu0 }
 0x24f   : > { %v1962_v0 = vpop.f32.mrb[34].mxu0 }
 0x250   : > { %v1363_v27 = vpop.f32.mrb[35].mxu0 }
 0x257   : > { %v3118_v58 = vpop.f32.mrb[36].mxu0 }
 0x258   : > { %v1373_v62 = vpop.f32.mrb[37].mxu0 }
 0x25f   : > { %v3120_v8 = vpop.f32.mrb[38].mxu0 }
 0x260   : > { %v3122_v55 = vpop.f32.mrb[39].mxu0 }
 0x267   : > { %v3124_v15 = vpop.f32.mrb[40].mxu0 }
 0x268   : > { %v3126_v23 = vpop.f32.mrb[41].mxu0 }
 0x26f   : > { %v3128_v31 = vpop.f32.mrb[42].mxu0 }
 0x270   : > { %v3130_v48 = vpop.f32.mrb[43].mxu0 }
 0x277   : > { %v3132_v12 = vpop.f32.mrb[44].mxu0 }
 0x278   : > { %v3134_v25 = vpop.f32.mrb[45].mxu0 }
 0x27b   : > { %v1789_v17 = vpop.f32.mrb[16].mxu1 }
 0x27c   : > { %v1790_v43 = vpop.f32.mrb[17].mxu1  ;;  %v3141_v54 = vpop.f32.mrb[46].mxu0 }
 0x27d   : > { %v1791_v61 = vadd.f32 %v1790_v43, %v1789_v17  ;;  %v3143_v11 = vpop.f32.mrb[47].mxu0 }
 0x27f   : > { %v1209_v39 = vadd.f32 %v1791_v61, %v3139_v40  ;;  %v1792_v26 = vpop.f32.mrb[18].mxu1 }
 0x280   : > { %v1793_v4 = vpop.f32.mrb[19].mxu1 }
 0x281   : > { %v1354_v56 = vadd.f32 %v1353_v32, %v1209_v39  ;;  %v1794_v52 = vadd.f32 %v1793_v4, %v1792_v26  ;;  %v2185_v32 = vld [vmem:[%s2579_s12 + $0x28] sm:$0xff]  ;;  %v2186_v26 = vld [vmem:[%s2579_s12 + $0x30] sm:$0xff] }
 0x283   : > { %v1432_v63 = vadd.f32 %v2180_v7, %v1354_v56  ;;  %v1214_v34 = vadd.f32 %v1794_v52, %v3139_v40  ;;  %v1795_v41 = vpop.f32.mrb[20].mxu1 }
 0x284   : > { %v1796_v51 = vpop.f32.mrb[21].mxu1 }
 0x285   : > { %v1448_v49 = vmax.f32 %v1432_v63, 0.0  ;;  %v1359_v53 = vadd.f32 %v1959_v46, %v1214_v34  ;;  %v1797_v18 = vadd.f32 %v1796_v51, %v1795_v41  ;;  %v2187_v41 = vld [vmem:[%s2579_s12 + $0x38] sm:$0xff] }
 0x287   : > { %1464 = vst [vmem:[%s3150_s10] sm:$0xff] %v1448_v49  ;;  %v1433_v42 = vadd.f32 %v2181_v35, %v1359_v53  ;;  %v1219_v1 = vadd.f32 %v1797_v18, %v3139_v40  ;;  %v1798_v3 = vpop.f32.mrb[22].mxu1 }
 0x288   : > { %v1799_v16 = vpop.f32.mrb[23].mxu1 }
 0x289   : > { %v1449_v33 = vmax.f32 %v1433_v42, 0.0  ;;  %v1364_v19 = vadd.f32 %v1363_v27, %v1219_v1  ;;  %v1800_v9 = vadd.f32 %v1799_v16, %v1798_v3  ;;  %v2188_v1 = vld [vmem:[%s2579_s12 + $0x40] sm:$0xff] }
 0x28b   : > { %1465 = vst [vmem:[%s3150_s10 + $0x8] sm:$0xff] %v1449_v33  ;;  %v1434_v22 = vadd.f32 %v2182_v29, %v1364_v19  ;;  %v1224_v21 = vadd.f32 %v1800_v9, %v3139_v40  ;;  %v1801_v24 = vpop.f32.mrb[24].mxu1 }
 0x28c   : > { %v1802_v38 = vpop.f32.mrb[25].mxu1 }
 0x28d   : > { %v1450_v5 = vmax.f32 %v1434_v22, 0.0  ;;  %v1369_v36 = vadd.f32 %v1962_v0, %v1224_v21  ;;  %v1803_v44 = vadd.f32 %v1802_v38, %v1801_v24  ;;  %v2189_v22 = vld [vmem:[%s2579_s12 + $0x48] sm:$0xff] }
 0x28f   : > { %1466 = vst [vmem:[%s3150_s10 + $0x10] sm:$0xff] %v1450_v5  ;;  %v1435_v13 = vadd.f32 %v2183_v6, %v1369_v36  ;;  %v1229_v57 = vadd.f32 %v1803_v44, %v3139_v40  ;;  %v1804_v59 = vpop.f32.mrb[26].mxu1  ;;  %v2190_v6 = vld [vmem:[%s2579_s12 + $0x50] sm:$0xff] }
 0x290   : > { %v1805_v37 = vpop.f32.mrb[27].mxu1 }
 0x291   : > { %v1451_v47 = vmax.f32 %v1435_v13, 0.0  ;;  %v1374_v20 = vadd.f32 %v1373_v62, %v1229_v57  ;;  %v1806_v50 = vadd.f32 %v1805_v37, %v1804_v59 }
 0x293   : > { %1467 = vst [vmem:[%s3150_s10 + $0x18] sm:$0xff] %v1451_v47  ;;  %v1436_v60 = vadd.f32 %v2184_v2, %v1374_v20  ;;  %v1234_v30 = vadd.f32 %v1806_v50, %v3139_v40  ;;  %v1807_v10 = vpop.f32.mrb[28].mxu1  ;;  %v2191_v50 = vld [vmem:[%s2579_s12 + $0x58] sm:$0xff] }
 0x294   : > { %v1808_v45 = vpop.f32.mrb[29].mxu1 }
 0x295   : > { %v1452_v28 = vmax.f32 %v1436_v60, 0.0  ;;  %v1379_v14 = vadd.f32 %v3118_v58, %v1234_v30  ;;  %v1809_v46 = vadd.f32 %v1808_v45, %v1807_v10 }
 0x297   : > { %1468 = vst [vmem:[%s3150_s10 + $0x20] sm:$0xff] %v1452_v28  ;;  %v1437_v0 = vadd.f32 %v2185_v32, %v1379_v14  ;;  %v1239_v27 = vadd.f32 %v1809_v46, %v3139_v40  ;;  %v1810_v62 = vpop.f32.mrb[30].mxu1  ;;  %v2192_v14 = vld [vmem:[%s2579_s12 + $0x60] sm:$0xff] }
 0x298   : > { %v1811_v17 = vpop.f32.mrb[31].mxu1 }
 0x299   : > { %v1453_v43 = vmax.f32 %v1437_v0, 0.0  ;;  %v1384_v61 = vadd.f32 %v3122_v55, %v1239_v27  ;;  %v1812_v39 = vadd.f32 %v1811_v17, %v1810_v62 }
 0x29b   : > { %1469 = vst [vmem:[%s3150_s10 + $0x28] sm:$0xff] %v1453_v43  ;;  %v1438_v4 = vadd.f32 %v2186_v26, %v1384_v61  ;;  %v1244_v58 = vadd.f32 %v1812_v39, %v3139_v40  ;;  %v1813_v56 = vpop.f32.mrb[32].mxu1  ;;  %v2193_v43 = vld [vmem:[%s2579_s12 + $0x68] sm:$0xff] }
 0x29c   : > { %v1814_v52 = vpop.f32.mrb[33].mxu1 }
 0x29d   : > { %v1454_v7 = vmax.f32 %v1438_v4, 0.0  ;;  %v1389_v63 = vadd.f32 %v3120_v8, %v1244_v58  ;;  %v1815_v34 = vadd.f32 %v1814_v52, %v1813_v56 }
 0x29f   : > { %1470 = vst [vmem:[%s3150_s10 + $0x30] sm:$0xff] %v1454_v7  ;;  %v1439_v51 = vadd.f32 %v2187_v41, %v1389_v63  ;;  %v1249_v55 = vadd.f32 %v1815_v34, %v3139_v40  ;;  %v1816_v49 = vpop.f32.mrb[34].mxu1  ;;  %v2195_v41 = vld [vmem:[%s2579_s12 + $0x78] sm:$0xff] }
 0x2a0   : > { %v1817_v53 = vpop.f32.mrb[35].mxu1 }
 0x2a1   : > { %v1455_v18 = vmax.f32 %v1439_v51, 0.0  ;;  %v1394_v35 = vadd.f32 %v3126_v23, %v1249_v55  ;;  %v1818_v42 = vadd.f32 %v1817_v53, %v1816_v49 }
 0x2a3   : > { %1471 = vst [vmem:[%s3150_s10 + $0x38] sm:$0xff] %v1455_v18  ;;  %v1440_v3 = vadd.f32 %v2188_v1, %v1394_v35  ;;  %v1254_v8 = vadd.f32 %v1818_v42, %v3139_v40  ;;  %v1819_v16 = vpop.f32.mrb[36].mxu1 }
 0x2a4   : > { %v1820_v33 = vpop.f32.mrb[37].mxu1 }
 0x2a5   : > { %v1456_v19 = vmax.f32 %v1440_v3, 0.0  ;;  %v1399_v9 = vadd.f32 %v3124_v15, %v1254_v8  ;;  %v1821_v29 = vadd.f32 %v1820_v33, %v1819_v16 }
 0x2a7   : > { %1472 = vst [vmem:[%s3150_s10 + $0x40] sm:$0xff] %v1456_v19  ;;  %v1441_v21 = vadd.f32 %v2189_v22, %v1399_v9  ;;  %v1259_v23 = vadd.f32 %v1821_v29, %v3139_v40  ;;  %v1822_v24 = vpop.f32.mrb[38].mxu1 }
 0x2a8   : > { %v1823_v38 = vpop.f32.mrb[39].mxu1 }
 0x2a9   : > { %v1457_v5 = vmax.f32 %v1441_v21, 0.0  ;;  %v1404_v36 = vadd.f32 %v3130_v48, %v1259_v23  ;;  %v1824_v44 = vadd.f32 %v1823_v38, %v1822_v24 }
 0x2ab   : > { %1473 = vst [vmem:[%s3150_s10 + $0x48] sm:$0xff] %v1457_v5  ;;  %v1442_v13 = vadd.f32 %v2190_v6, %v1404_v36  ;;  %v1264_v15 = vadd.f32 %v1824_v44, %v3139_v40  ;;  %v1825_v57 = vpop.f32.mrb[40].mxu1 }
 0x2ac   : > { %v1826_v59 = vpop.f32.mrb[41].mxu1 }
 0x2ad   : > { %v1458_v37 = vmax.f32 %v1442_v13, 0.0  ;;  %v1409_v47 = vadd.f32 %v3128_v31, %v1264_v15  ;;  %v1827_v20 = vadd.f32 %v1826_v59, %v1825_v57 }
 0x2af   : > { %1474 = vst [vmem:[%s3150_s10 + $0x50] sm:$0xff] %v1458_v37  ;;  %v1443_v2 = vadd.f32 %v2191_v50, %v1409_v47  ;;  %v1269_v48 = vadd.f32 %v1827_v20, %v3139_v40  ;;  %v1828_v60 = vpop.f32.mrb[42].mxu1 }
 0x2b0   : > { %v1829_v30 = vpop.f32.mrb[43].mxu1 }
 0x2b1   : > { %v1459_v10 = vmax.f32 %v1443_v2, 0.0  ;;  %v1414_v45 = vadd.f32 %v3134_v25, %v1269_v48  ;;  %v1830_v28 = vadd.f32 %v1829_v30, %v1828_v60 }
 0x2b3   : > { %1475 = vst [vmem:[%s3150_s10 + $0x58] sm:$0xff] %v1459_v10  ;;  %v1444_v46 = vadd.f32 %v2192_v14, %v1414_v45  ;;  %v1274_v31 = vadd.f32 %v1830_v28, %v3139_v40  ;;  %v1831_v32 = vpop.f32.mrb[44].mxu1 }
 0x2b4   : > { %v1832_v0 = vpop.f32.mrb[45].mxu1 }
 0x2b5   : > { %v1460_v27 = vmax.f32 %v1444_v46, 0.0  ;;  %v1419_v62 = vadd.f32 %v3132_v12, %v1274_v31  ;;  %v1833_v17 = vadd.f32 %v1832_v0, %v1831_v32  ;;  %v2194_v12 = vld [vmem:[%s2579_s12 + $0x70] sm:$0xff] }
 0x2b7   : > { %1476 = vst [vmem:[%s3150_s10 + $0x60] sm:$0xff] %v1460_v27  ;;  %v1445_v25 = vadd.f32 %v2193_v43, %v1419_v62  ;;  %v1279_v61 = vadd.f32 %v1833_v17, %v3139_v40  ;;  %v1834_v39 = vpop.f32.mrb[46].mxu1 }
 0x2b8   : > { %v1835_v26 = vpop.f32.mrb[47].mxu1 }
 0x2b9   : > { %v1461_v4 = vmax.f32 %v1445_v25, 0.0  ;;  %v1424_v58 = vadd.f32 %v3143_v11, %v1279_v61  ;;  %v1836_v56 = vadd.f32 %v1835_v26, %v1834_v39 }
 0x2bb   : > { %1477 = vst [vmem:[%s3150_s10 + $0x68] sm:$0xff] %v1461_v4  ;;  %v1446_v52 = vadd.f32 %v2194_v12, %v1424_v58  ;;  %v1284_v7 = vadd.f32 %v1836_v56, %v3139_v40 }
 0x2bd   : > { %v1462_v63 = vmax.f32 %v1446_v52, 0.0  ;;  %v1429_v34 = vadd.f32 %v3141_v54, %v1284_v7 }
 0x2bf   : > { %1478 = vst [vmem:[%s3150_s10 + $0x70] sm:$0xff] %v1462_v63  ;;  %v1447_v51 = vadd.f32 %v2195_v41, %v1429_v34 }
 0x2c1   : > { %v1463_v11 = vmax.f32 %v1447_v51, 0.0 }
 0x2c3   : > { %1479 = vst [vmem:[%s3150_s10 + $0x78] sm:$0xff] %v1463_v11 }
 0x2c4   : > { %2295 = shalt.err (!%p2292_p1)
}
 0x2c5   : > { %s2296_s12 = scalar_lea.hbm %s3212_s11, 2048  ;;  %s2300_s15 = scalar_lea.hbm %s3264_s5, 4096 }
 0x2c6   : > { %p2297_p13 = scmp.ne.s32.totalorder %s3212_s11, %s2296_s12  ;;  %p2301_p4 = scmp.lt.u32.totalorder %s3212_s11, %s3264_s5 }
 0x2c7   : > { %p2302_p5 = scmp.lt.u32.totalorder %s2300_s15, %s2296_s12  ;;  %p2304_p11 = scmp.lt.u32.totalorder %s2296_s12, %s3212_s11 }
 0x2c8   : > { %p2298_p6 = pnand %p2297_p13, %p3342_p0 }
 0x2c9   : > { %p2303_p8 = por %p2302_p5, %p2301_p4 }
 0x2ca   : > { %p2299_p10 = pneg %p2298_p6 }
 0x2cb   : > { %p2305_p2 = por %p2304_p11, %p2303_p8 }
 0x2cd   : > { %p2306_p3 = pnand %p2305_p2, %p2299_p10 }
 0x2cf   : > { %2309 = shalt.err (!%p2306_p3)
}
 0x2d0   : > { %s2360_s28 = smov 128   ;;  %s2361_s9 = smov 8  }
 0x2d1   : > { %2119 = dma.vmem_to_hbm [thread:$0]  (%p3342_p0), %s3214_s13, 2048, %s3212_s11, %s1481_s17, %s2360_s28, %s2360_s28, %s2361_s9  }
 0x2d2 PF: > { %s1510_s30 = sand.u32 1, %s2340_s18   ;;  %p3343_p7 = scmp.ne.s32.totalorder %s3273_s25, 0 }
 0x2d3   : > { %p3344_p9 = scmp.ge.s32.totalorder %s2352_s21, 2  ;;  %s1511_s7 = scalar_lea.sflag [#allocation4], %s1510_s30 }
 0x2d5   : > { %p2133_p12 = pnand %p3344_p9, %p3343_p7 }
 0x2d7   : > { %2335 = dma.done.wait (!%p2133_p12), %s1511_s7, 2048  }
 0x2d8   : > { %2337 = vsyncadd (!%p2133_p12), %s1511_s7, 4294965248  ;;  %p19_p1 = scmp.ge.s32.totalorder %s2508_s29, 4   ;;  %s3345_s18 = smov %s2344_s19 }
 0x2d9   : > { %s3346_s19 = smov %s2348_s20  ;;  %s3347_s20 = smov %s2524_s27 }
 0x2da   : > { %s3348_s21 = smov %s2508_s29  ;;  %21 = sbr.rel (!%p19_p1) target bundleno = 6 (0x6), region = 93 }
 0x2e1   :  { %1516 = vsyncpa [#allocation3], 1 }
 0x2e2   :  { %1518 = vsyncpa [#allocation3 + $0x1], 1 }
 0x2e3   :  { %1519 = vsyncpa [#allocation6], 1 }
 0x2e4   :  { %1520 = vsyncpa [#allocation4], 1 }
 0x2e5   :  { %1522 = vsyncpa [#allocation4 + $0x1], 1 }

</bundles_post_ra>
